<compile_context>
chip_gen: v7x
topology: tpu7x:2x2x1
jax: 0.10.0
libtpu: 0.0.40
codegen_flags: <defaults>
</compile_context>

<pallas_src>
import functools

import jax
import jax.numpy as jnp
from jax import lax
from jax.experimental import pallas as pl
from jax.experimental.pallas import tpu as pltpu

_BN_EPS = 1e-5


# ----------------------------- Pallas kernel ------------------------------- #
def _block_kernel(x_ref, w_rep_ref, b_rep_ref, w2_ref, b2_ref, o_ref,
                  *, H, W, tile_h, shortcut):
    """One (batch n, row-tile t) step of the fused RepConv + ConvBNAct block.

    x_ref     : (H+4, W, Cin)      H-zero-padded image for batch element n
    w_rep_ref : (3, 3*Cin, Ch)     RepConv 3x3(+1x1,+BN) folded weights, one mat per dy
    b_rep_ref : (1, Ch)   f32      RepConv folded bias
    w2_ref    : (3, 3*Ch, Cout)    ConvBNAct 3x3(+BN) folded weights, one mat per dy
    b2_ref    : (1, Cout) f32      ConvBNAct folded bias
    o_ref     : (tile_h, W, Cout)  output row tile
    """
    Cin = x_ref.shape[-1]
    Ch = w_rep_ref.shape[-1]
    Cout = w2_ref.shape[-1]
    R = tile_h + 2            # intermediate y rows (1-row halo each side)
    P = tile_h + 4            # padded-x rows feeding those y rows

    t = pl.program_id(1)
    r0 = t * tile_h           # top output row of this tile (== padded-x row offset)
    if tile_h % 8 == 0:
        r0 = pl.multiple_of(r0, 8)

    cdt = x_ref.dtype

    # Edge-column mask shared by both convs: the wrapped column of the roll is the
    # conv's zero padding at w == 0 / w == W-1.
    col = lax.broadcasted_iota(jnp.int32, (1, W, 1), 1)

    def dx_im2col(v):
        # v: (rows, W, C) -> (rows, W, 3*C) = [x[w-1], x[w], x[w+1]] along lanes.
        # pltpu.roll follows jnp.roll semantics: roll(v, s, axis)[w] = v[w - s].
        left = jnp.where(col >= 1, pltpu.roll(v, 1, 1), jnp.zeros_like(v))
        right = jnp.where(col < W - 1, pltpu.roll(v, W - 1, 1), jnp.zeros_like(v))
        return jnp.concatenate([left, v, right], axis=-1)

    # ---- RepConv: 3x3 (+1x1) conv with BN folded, Identity activation --------
    xt = x_ref[pl.ds(r0, P), :, :]                      # (P, W, Cin)
    xcat = dx_im2col(xt)                                # (P, W, 3*Cin)
    acc = None
    for dy in range(3):                                 # 3 MXU dots, K = 3*Cin
        lhs = xcat[dy:dy + R].reshape(R * W, 3 * Cin)
        part = jnp.dot(lhs, w_rep_ref[dy], preferred_element_type=jnp.float32)
        acc = part if acc is None else acc + part
    y = (acc + b_rep_ref[...]).reshape(R, W, Ch)        # f32

    # y halo rows outside [0, H) are the *second* conv's zero padding -> zero them.
    yrow = lax.broadcasted_iota(jnp.int32, (R, 1, 1), 0) + (r0 - 1)
    y = jnp.where(jnp.logical_and(yrow >= 0, yrow < H), y, 0.0)

    # ---- ConvBNAct: 3x3 conv + folded BN + ReLU over the y tile --------------
    # (y is rounded to the compute dtype here on purpose - bf16 MXU inputs.)
    ycat = dx_im2col(y.astype(cdt))                     # (R, W, 3*Ch)
    acc2 = None
    for dy in range(3):                                 # 3 MXU dots, K = 3*Ch
        lhs = ycat[dy:dy + tile_h].reshape(tile_h * W, 3 * Ch)
        part = jnp.dot(lhs, w2_ref[dy], preferred_element_type=jnp.float32)
        acc2 = part if acc2 is None else acc2 + part
    z = jnp.maximum(acc2 + b2_ref[...], 0.0)            # (tile_h*W, Cout), f32

    # ---- residual (rows already resident in xt; bf16 residual is intentional) --
    if shortcut:
        xres = xt[2:2 + tile_h].reshape(tile_h * W, Cin)
        z = z + xres.astype(jnp.float32)

    o_ref[...] = z.reshape(tile_h, W, Cout).astype(o_ref.dtype)


# ------------------------------- host glue --------------------------------- #
def _fold_bn(w_oihw, bn, eps=_BN_EPS):
    """Fold eval-mode BatchNorm into a conv weight (returns HWIO weight + bias)."""
    scale = bn['gamma'] / jnp.sqrt(bn['var'] + eps)           # (O,)
    w_hwio = jnp.transpose(w_oihw, (2, 3, 1, 0)) * scale      # broadcast over O (last)
    bias = bn['beta'] - bn['mean'] * scale
    return w_hwio, bias


def _pick_tile_h(H, W, c_mid, c_out):
    """Largest divisor of H whose f32 accumulator ((tile_h+2)*W*C*4 B) fits ~1 MiB."""
    acc_budget = 1 << 20
    fallback = None
    for cand in (128, 64, 32, 16, 8, 4, 2, 1):
        if cand > H or H % cand:
            continue
        if fallback is None:
            fallback = cand
        if (cand + 2) * W * max(c_mid, c_out) * 4 <= acc_budget:
            return cand
    return fallback if fallback is not None else H


def _padded_bytes(shape, dtype):
    s = list(shape)
    s[-1] = -(-s[-1] // 128) * 128
    if len(s) >= 2:
        s[-2] = -(-s[-2] // 8) * 8
    n = jnp.dtype(dtype).itemsize
    for d in s:
        n *= d
    return n


@functools.partial(jax.jit, static_argnames=('shortcut', 'tile_h', 'compute_dtype'))
def basic_block_3x3_reverse(x_nchw, params, shortcut=True, tile_h=None,
                            compute_dtype=jnp.bfloat16):
    N, Cin, H, W = x_nchw.shape

    # Fold BNs and fuse the RepConv 1x1 branch into the 3x3 kernel's center tap.
    w3f, b3 = _fold_bn(params['rep_w3'], params['rep_bn3'])    # (3,3,Cin,Ch)
    w1f, b1 = _fold_bn(params['rep_w1'], params['rep_bn1'])    # (1,1,Cin,Ch)
    w_rep = w3f.at[1, 1].add(w1f[0, 0])
    b_rep = b3 + b1
    wcf, bc = _fold_bn(params['conv1_w'], params['conv1_bn'])  # (3,3,Ch,Cout)

    Ch, Cout = w_rep.shape[-1], wcf.shape[-1]
    assert Cin == Cout, "module asserts ch_in == ch_out"
    assert W % 8 == 0, "W must be a multiple of 8 (sublane); pad W outside the kernel"

    if tile_h is None:
        tile_h = _pick_tile_h(H, W, Ch, Cout)
    tile_h = min(tile_h, H)
    assert H % tile_h == 0, "tile_h must divide H"

    cdt = jnp.dtype(compute_dtype)
    x_nhwc = jnp.transpose(x_nchw, (0, 2, 3, 1)).astype(cdt)
    # One cheap HBM-level pad (2 zero rows top/bottom) - the only halo that cannot
    # be realized in-register.  The W halo is done in-kernel with pltpu.roll.
    x_pad = jnp.pad(x_nhwc, ((0, 0), (2, 2), (0, 0), (0, 0)))

    # dx-im2col weight layout: one (3*Cin, Ch) matrix per dy tap (kx-major rows,
    # matching the [x[w-1], x[w], x[w+1]] lane concatenation in the kernel).
    w_rep_k = w_rep.reshape(3, 3 * Cin, Ch).astype(cdt)
    w2_k = wcf.reshape(3, 3 * Ch, Cout).astype(cdt)
    b_rep_k = b_rep.reshape(1, Ch).astype(jnp.float32)
    b2_k = bc.reshape(1, Cout).astype(jnp.float32)

    # VMEM budget (lane/sublane padded): declared blocks (x2 for double buffering)
    # PLUS the in-kernel f32 accumulators and im2col temporaries.
    R, P = tile_h + 2, tile_h + 4
    est = (2 * _padded_bytes((1, H + 4, W, Cin), cdt)            # x block
           + 2 * _padded_bytes((1, tile_h, W, Cout), cdt)        # out block
           + 2 * (_padded_bytes((3, 3 * Cin, Ch), cdt)
                  + _padded_bytes((3, 3 * Ch, Cout), cdt)
                  + _padded_bytes((1, Ch), jnp.float32)
                  + _padded_bytes((1, Cout), jnp.float32))
           + 3 * _padded_bytes((P, W, Cin), cdt)                 # xt + 2 shifted views
           + _padded_bytes((P, W, 3 * Cin), cdt)                 # xcat
           + _padded_bytes((R * W, Ch), jnp.float32)             # conv1 f32 accumulator
           + 3 * _padded_bytes((R, W, Ch), cdt)                  # y(cdt) + 2 shifted views
           + _padded_bytes((R, W, 3 * Ch), cdt)                  # ycat
           + 2 * _padded_bytes((tile_h * W, Cout), jnp.float32))  # conv2 acc + epilogue
    vmem_limit = 48 * 1024 * 1024    # < v7x 64 MiB physical; > 32 MiB default on v5e/v6e
    assert est <= vmem_limit, (
        f"estimated VMEM {est} B exceeds {vmem_limit} B; reduce tile_h "
        "(and/or add W tiling) for this shape")

    flops = 2 * N * H * W * 9 * (Cin * Ch + Ch * Cout)
    bytes_accessed = (x_pad.size * x_pad.dtype.itemsize
                      + N * H * W * Cout * jnp.dtype(cdt).itemsize
                      + (w_rep_k.size + w2_k.size) * jnp.dtype(cdt).itemsize
                      + (b_rep_k.size + b2_k.size) * 4)

    grid = (N, H // tile_h)
    kernel = functools.partial(_block_kernel, H=H, W=W, tile_h=tile_h,
                               shortcut=shortcut)

    out_nhwc = pl.pallas_call(
        kernel,
        out_shape=jax.ShapeDtypeStruct((N, H, W, Cout), cdt),
        grid=grid,
        in_specs=[
            # Full H-padded image per batch element; the block index is constant in
            # t, so it is DMA'd once per image and reused across row tiles.
            pl.BlockSpec((None, H + 4, W, Cin), lambda n, t: (n, 0, 0, 0)),
            # Grid-constant folded weights / biases.
            # (Next knob: pipeline_mode=pl.Buffered(1) here to halve weight VMEM at
            #  large C - the blocks never change across the grid.)
            pl.BlockSpec((3, 3 * Cin, Ch), lambda n, t: (0, 0, 0)),
            pl.BlockSpec((1, Ch), lambda n, t: (0, 0)),
            pl.BlockSpec((3, 3 * Ch, Cout), lambda n, t: (0, 0, 0)),
            pl.BlockSpec((1, Cout), lambda n, t: (0, 0)),
        ],
        out_specs=pl.BlockSpec((None, tile_h, W, Cout), lambda n, t: (n, t, 0, 0)),
        compiler_params=pltpu.CompilerParams(
            # No carried state across either axis -> both parallel (v7x megacore
            # can split the row-tile axis even when N == 1).
            dimension_semantics=("parallel", "parallel"),
            vmem_limit_bytes=vmem_limit,
        ),
        cost_estimate=pl.CostEstimate(flops=flops, transcendentals=0,
                                      bytes_accessed=bytes_accessed),
    )(x_pad, w_rep_k, b_rep_k, w2_k, b2_k)

    return jnp.transpose(out_nhwc.astype(jnp.float32), (0, 3, 1, 2))


# ------------------------- deterministic parameters ------------------------ #
def _init_bn(key, c):
    k1, k2, k3, k4 = jax.random.split(key, 4)
    return {
        'gamma': jax.random.uniform(k1, (c,), jnp.float32, 0.8, 1.2),
        'beta': 0.1 * jax.random.normal(k2, (c,), jnp.float32),
        'mean': 0.1 * jax.random.normal(k3, (c,), jnp.float32),
        'var': jax.random.uniform(k4, (c,), jnp.float32, 0.5, 1.5),
    }


def init_params(key, c_in, c_hidden, c_out):
    ks = jax.random.split(key, 6)
    return {
        # RepConv(c_in -> c_hidden): 3x3 branch + 1x1 branch, each with its own BN.
        'rep_w3': 0.1 * jax.random.normal(ks[0], (c_hidden, c_in, 3, 3), jnp.float32),
        'rep_bn3': _init_bn(ks[1], c_hidden),
        'rep_w1': 0.1 * jax.random.normal(ks[2], (c_hidden, c_in, 1, 1), jnp.float32),
        'rep_bn1': _init_bn(ks[3], c_hidden),
        # ConvBNAct(c_hidden -> c_out): 3x3 conv + BN + ReLU.
        'conv1_w': 0.1 * jax.random.normal(ks[4], (c_out, c_hidden, 3, 3), jnp.float32),
        'conv1_bn': _init_bn(ks[5], c_out),
    }


# ----------------------------- pure-JAX reference -------------------------- #
def reference_forward(x_nchw, params, shortcut=True, eps=_BN_EPS):
    x = jnp.transpose(x_nchw, (0, 2, 3, 1)).astype(jnp.float32)

    def conv(v, w_oihw, pad):
        w = jnp.transpose(w_oihw, (2, 3, 1, 0))
        return lax.conv_general_dilated(v, w, (1, 1), [(pad, pad), (pad, pad)],
                                        dimension_numbers=('NHWC', 'HWIO', 'NHWC'))

    def bn(v, p):
        return (v - p['mean']) / jnp.sqrt(p['var'] + eps) * p['gamma'] + p['beta']

    y = bn(conv(x, params['rep_w3'], 1), params['rep_bn3']) + \
        bn(conv(x, params['rep_w1'], 0), params['rep_bn1'])        # RepConv, Identity act
    z = jax.nn.relu(bn(conv(y, params['conv1_w'], 1), params['conv1_bn']))
    out = x + z if shortcut else z
    return jnp.transpose(out, (0, 3, 1, 2))


# ----------------------------------- main ----------------------------------- #
if __name__ == "__main__":
    key = jax.random.PRNGKey(0)
    N, C, H, W = 2, 8, 16, 16
    ch_hidden_ratio = 1.0
    Ch = int(C * ch_hidden_ratio)

    kx, kp = jax.random.split(key)
    x = jax.random.normal(kx, (N, C, H, W), jnp.float32)
    params = init_params(kp, C, Ch, C)

    ref = reference_forward(x, params, shortcut=True)

    # Exactness check: f32 path, tile_h=8 -> 2 row tiles per image (exercises the
    # halo masking at both image edges and at the interior tile boundary).
    out_f32 = basic_block_3x3_reverse(x, params, shortcut=True, tile_h=8,
                                      compute_dtype=jnp.float32)
    out_f32 = jax.block_until_ready(out_f32)
    assert out_f32.shape == (N, C, H, W), out_f32.shape
    err32 = float(jnp.max(jnp.abs(out_f32 - ref)))
    assert err32 < 2e-4, f"f32 path max abs err = {err32}"

    # Production path: bf16 storage + bf16 MXU inputs, f32 accumulation/epilogue;
    # auto tile_h (single row tile at this H) -> exercises the other tiling path.
    out_bf16 = basic_block_3x3_reverse(x, params, shortcut=True, tile_h=None,
                                       compute_dtype=jnp.bfloat16)
    out_bf16 = jax.block_until_ready(out_bf16)
    errbf = float(jnp.max(jnp.abs(out_bf16 - ref)))
    assert errbf < 3e-1, f"bf16 path max abs err = {errbf}"

    print("KERNEL_OK")
</pallas_src>

<mosaic_0001>
module attributes {stable_mosaic.version = 11 : i64} {
  func.func @_block_kernel(%arg0: i32, %arg1: i32, %arg2: memref<1x20x16x8xf32, #tpu.memory_space<vmem>>, %arg3: memref<3x24x8xf32, #tpu.memory_space<vmem>>, %arg4: memref<1x8xf32, #tpu.memory_space<vmem>>, %arg5: memref<3x24x8xf32, #tpu.memory_space<vmem>>, %arg6: memref<1x8xf32, #tpu.memory_space<vmem>>, %arg7: memref<1x8x16x8xf32, #tpu.memory_space<vmem>>) attributes {dimension_semantics = [#tpu.dimension_semantics<parallel>, #tpu.dimension_semantics<parallel>], iteration_bounds = array<i64: 2, 2>, scalar_prefetch = 0 : i64, scratch_operands = 0 : i64, tpu.core_type = #tpu.core_type<tc>, window_params = [{transform_indices = @transform_0, window_bounds = array<i64: 1, 20, 16, 8>}, {pipeline_mode = #tpu.pipeline_mode<synchronous>, transform_indices = @transform_1, window_bounds = array<i64: 3, 24, 8>}, {pipeline_mode = #tpu.pipeline_mode<synchronous>, transform_indices = @transform_2, window_bounds = array<i64: 1, 8>}, {pipeline_mode = #tpu.pipeline_mode<synchronous>, transform_indices = @transform_3, window_bounds = array<i64: 3, 24, 8>}, {pipeline_mode = #tpu.pipeline_mode<synchronous>, transform_indices = @transform_4, window_bounds = array<i64: 1, 8>}, {transform_indices = @transform_5, window_bounds = array<i64: 1, 8, 16, 8>}]} {
    %c8_i32 = arith.constant 8 : i32
    %0 = arith.muli %arg1, %c8_i32 : i32
    %1 = tpu.assume_multiple %0, 8 : i32
    %2 = tpu.iota {dimensions = array<i32: 1>} : vector<1x16x1xi32>
    %c0 = arith.constant 0 : index
    %3 = arith.index_cast %1 : i32 to index
    %c0_0 = arith.constant 0 : index
    %c0_1 = arith.constant 0 : index
    %4 = vector.load %arg2[%c0, %3, %c0_0, %c0_1] : memref<1x20x16x8xf32, #tpu.memory_space<vmem>>, vector<1x12x16x8xf32>
    %5 = vector.shape_cast %4 : vector<1x12x16x8xf32> to vector<12x16x8xf32>
    %c1_i32 = arith.constant 1 : i32
    %6 = vector.broadcast %c1_i32 : i32 to vector<1x16x1xi32>
    %7 = arith.cmpi sge, %2, %6 : vector<1x16x1xi32>
    %c1_i32_2 = arith.constant 1 : i32
    %8 = tpu.dynamic_rotate %5 by %c1_i32_2 dim 1 : vector<12x16x8xf32>, i32 -> vector<12x16x8xf32>
    %cst = arith.constant 0.000000e+00 : f32
    %9 = vector.broadcast %cst : f32 to vector<12x16x8xf32>
    %10 = vector.shape_cast %7 : vector<1x16x1xi1> to vector<1x16x1xi1>
    %11 = vector.broadcast %10 : vector<1x16x1xi1> to vector<12x16x8xi1>
    %12 = arith.select %11, %8, %9 : vector<12x16x8xi1>, vector<12x16x8xf32>
    %c15_i32 = arith.constant 15 : i32
    %13 = vector.broadcast %c15_i32 : i32 to vector<1x16x1xi32>
    %14 = arith.cmpi slt, %2, %13 : vector<1x16x1xi32>
    %c15_i32_3 = arith.constant 15 : i32
    %15 = tpu.dynamic_rotate %5 by %c15_i32_3 dim 1 : vector<12x16x8xf32>, i32 -> vector<12x16x8xf32>
    %cst_4 = arith.constant 0.000000e+00 : f32
    %16 = vector.broadcast %cst_4 : f32 to vector<12x16x8xf32>
    %17 = vector.shape_cast %14 : vector<1x16x1xi1> to vector<1x16x1xi1>
    %18 = vector.broadcast %17 : vector<1x16x1xi1> to vector<12x16x8xi1>
    %19 = arith.select %18, %15, %16 : vector<12x16x8xi1>, vector<12x16x8xf32>
    %20 = tpu.concatenate %12, %5, %19 in 2 : vector<12x16x8xf32>, vector<12x16x8xf32>, vector<12x16x8xf32> -> vector<12x16x24xf32>
    %21 = vector.extract_strided_slice %20 {offsets = [0, 0, 0], sizes = [10, 16, 24], strides = [1, 1, 1]} : vector<12x16x24xf32> to vector<10x16x24xf32>
    %22 = vector.shape_cast %21 : vector<10x16x24xf32> to vector<160x24xf32>
    %c0_5 = arith.constant 0 : index
    %c0_6 = arith.constant 0 : index
    %c0_7 = arith.constant 0 : index
    %23 = vector.load %arg3[%c0_5, %c0_6, %c0_7] : memref<3x24x8xf32, #tpu.memory_space<vmem>>, vector<1x24x8xf32>
    %24 = vector.shape_cast %23 : vector<1x24x8xf32> to vector<24x8xf32>
    %cst_8 = arith.constant dense<0.000000e+00> : vector<160x8xf32>
    %25 = tpu.matmul %22, %24, %cst_8 {dimension_numbers = #tpu.dot_dimension_numbers<[1], [0], [0], [1], [0, 0, 1, 1], [], []>} : vector<160x24xf32>, vector<24x8xf32>, vector<160x8xf32> -> vector<160x8xf32>
    %26 = vector.extract_strided_slice %20 {offsets = [1, 0, 0], sizes = [10, 16, 24], strides = [1, 1, 1]} : vector<12x16x24xf32> to vector<10x16x24xf32>
    %27 = vector.shape_cast %26 : vector<10x16x24xf32> to vector<160x24xf32>
    %c1 = arith.constant 1 : index
    %c0_9 = arith.constant 0 : index
    %c0_10 = arith.constant 0 : index
    %28 = vector.load %arg3[%c1, %c0_9, %c0_10] : memref<3x24x8xf32, #tpu.memory_space<vmem>>, vector<1x24x8xf32>
    %29 = vector.shape_cast %28 : vector<1x24x8xf32> to vector<24x8xf32>
    %cst_11 = arith.constant dense<0.000000e+00> : vector<160x8xf32>
    %30 = tpu.matmul %27, %29, %cst_11 {dimension_numbers = #tpu.dot_dimension_numbers<[1], [0], [0], [1], [0, 0, 1, 1], [], []>} : vector<160x24xf32>, vector<24x8xf32>, vector<160x8xf32> -> vector<160x8xf32>
    %31 = arith.addf %25, %30 : vector<160x8xf32>
    %32 = vector.extract_strided_slice %20 {offsets = [2, 0, 0], sizes = [10, 16, 24], strides = [1, 1, 1]} : vector<12x16x24xf32> to vector<10x16x24xf32>
    %33 = vector.shape_cast %32 : vector<10x16x24xf32> to vector<160x24xf32>
    %c2 = arith.constant 2 : index
    %c0_12 = arith.constant 0 : index
    %c0_13 = arith.constant 0 : index
    %34 = vector.load %arg3[%c2, %c0_12, %c0_13] : memref<3x24x8xf32, #tpu.memory_space<vmem>>, vector<1x24x8xf32>
    %35 = vector.shape_cast %34 : vector<1x24x8xf32> to vector<24x8xf32>
    %cst_14 = arith.constant dense<0.000000e+00> : vector<160x8xf32>
    %36 = tpu.matmul %33, %35, %cst_14 {dimension_numbers = #tpu.dot_dimension_numbers<[1], [0], [0], [1], [0, 0, 1, 1], [], []>} : vector<160x24xf32>, vector<24x8xf32>, vector<160x8xf32> -> vector<160x8xf32>
    %37 = arith.addf %31, %36 : vector<160x8xf32>
    %c0_15 = arith.constant 0 : index
    %c0_16 = arith.constant 0 : index
    %38 = vector.load %arg4[%c0_15, %c0_16] : memref<1x8xf32, #tpu.memory_space<vmem>>, vector<1x8xf32>
    %39 = vector.broadcast %38 : vector<1x8xf32> to vector<160x8xf32>
    %40 = arith.addf %37, %39 : vector<160x8xf32>
    %41 = vector.shape_cast %40 : vector<160x8xf32> to vector<10x16x8xf32>
    %42 = tpu.iota {dimensions = array<i32: 0>} : vector<10x1x1xi32>
    %c1_i32_17 = arith.constant 1 : i32
    %43 = arith.subi %1, %c1_i32_17 : i32
    %44 = vector.broadcast %43 : i32 to vector<10x1x1xi32>
    %45 = arith.addi %42, %44 : vector<10x1x1xi32>
    %c0_i32 = arith.constant 0 : i32
    %46 = vector.broadcast %c0_i32 : i32 to vector<10x1x1xi32>
    %47 = arith.cmpi sge, %45, %46 : vector<10x1x1xi32>
    %c16_i32 = arith.constant 16 : i32
    %48 = vector.broadcast %c16_i32 : i32 to vector<10x1x1xi32>
    %49 = arith.cmpi slt, %45, %48 : vector<10x1x1xi32>
    %50 = arith.andi %47, %49 : vector<10x1x1xi1>
    %cst_18 = arith.constant 0.000000e+00 : f32
    %51 = vector.shape_cast %50 : vector<10x1x1xi1> to vector<10x1x1xi1>
    %52 = vector.broadcast %51 : vector<10x1x1xi1> to vector<10x16x8xi1>
    %53 = vector.broadcast %cst_18 : f32 to vector<10x16x8xf32>
    %54 = arith.select %52, %41, %53 : vector<10x16x8xi1>, vector<10x16x8xf32>
    %c1_i32_19 = arith.constant 1 : i32
    %55 = vector.broadcast %c1_i32_19 : i32 to vector<1x16x1xi32>
    %56 = arith.cmpi sge, %2, %55 : vector<1x16x1xi32>
    %c1_i32_20 = arith.constant 1 : i32
    %57 = tpu.dynamic_rotate %54 by %c1_i32_20 dim 1 : vector<10x16x8xf32>, i32 -> vector<10x16x8xf32>
    %cst_21 = arith.constant 0.000000e+00 : f32
    %58 = vector.broadcast %cst_21 : f32 to vector<10x16x8xf32>
    %59 = vector.shape_cast %56 : vector<1x16x1xi1> to vector<1x16x1xi1>
    %60 = vector.broadcast %59 : vector<1x16x1xi1> to vector<10x16x8xi1>
    %61 = arith.select %60, %57, %58 : vector<10x16x8xi1>, vector<10x16x8xf32>
    %c15_i32_22 = arith.constant 15 : i32
    %62 = vector.broadcast %c15_i32_22 : i32 to vector<1x16x1xi32>
    %63 = arith.cmpi slt, %2, %62 : vector<1x16x1xi32>
    %c15_i32_23 = arith.constant 15 : i32
    %64 = tpu.dynamic_rotate %54 by %c15_i32_23 dim 1 : vector<10x16x8xf32>, i32 -> vector<10x16x8xf32>
    %cst_24 = arith.constant 0.000000e+00 : f32
    %65 = vector.broadcast %cst_24 : f32 to vector<10x16x8xf32>
    %66 = vector.shape_cast %63 : vector<1x16x1xi1> to vector<1x16x1xi1>
    %67 = vector.broadcast %66 : vector<1x16x1xi1> to vector<10x16x8xi1>
    %68 = arith.select %67, %64, %65 : vector<10x16x8xi1>, vector<10x16x8xf32>
    %69 = tpu.concatenate %61, %54, %68 in 2 : vector<10x16x8xf32>, vector<10x16x8xf32>, vector<10x16x8xf32> -> vector<10x16x24xf32>
    %70 = vector.extract_strided_slice %69 {offsets = [0, 0, 0], sizes = [8, 16, 24], strides = [1, 1, 1]} : vector<10x16x24xf32> to vector<8x16x24xf32>
    %71 = vector.shape_cast %70 : vector<8x16x24xf32> to vector<128x24xf32>
    %c0_25 = arith.constant 0 : index
    %c0_26 = arith.constant 0 : index
    %c0_27 = arith.constant 0 : index
    %72 = vector.load %arg5[%c0_25, %c0_26, %c0_27] : memref<3x24x8xf32, #tpu.memory_space<vmem>>, vector<1x24x8xf32>
    %73 = vector.shape_cast %72 : vector<1x24x8xf32> to vector<24x8xf32>
    %cst_28 = arith.constant dense<0.000000e+00> : vector<128x8xf32>
    %74 = tpu.matmul %71, %73, %cst_28 {dimension_numbers = #tpu.dot_dimension_numbers<[1], [0], [0], [1], [0, 0, 1, 1], [], []>} : vector<128x24xf32>, vector<24x8xf32>, vector<128x8xf32> -> vector<128x8xf32>
    %75 = vector.extract_strided_slice %69 {offsets = [1, 0, 0], sizes = [8, 16, 24], strides = [1, 1, 1]} : vector<10x16x24xf32> to vector<8x16x24xf32>
    %76 = vector.shape_cast %75 : vector<8x16x24xf32> to vector<128x24xf32>
    %c1_29 = arith.constant 1 : index
    %c0_30 = arith.constant 0 : index
    %c0_31 = arith.constant 0 : index
    %77 = vector.load %arg5[%c1_29, %c0_30, %c0_31] : memref<3x24x8xf32, #tpu.memory_space<vmem>>, vector<1x24x8xf32>
    %78 = vector.shape_cast %77 : vector<1x24x8xf32> to vector<24x8xf32>
    %cst_32 = arith.constant dense<0.000000e+00> : vector<128x8xf32>
    %79 = tpu.matmul %76, %78, %cst_32 {dimension_numbers = #tpu.dot_dimension_numbers<[1], [0], [0], [1], [0, 0, 1, 1], [], []>} : vector<128x24xf32>, vector<24x8xf32>, vector<128x8xf32> -> vector<128x8xf32>
    %80 = arith.addf %74, %79 : vector<128x8xf32>
    %81 = vector.extract_strided_slice %69 {offsets = [2, 0, 0], sizes = [8, 16, 24], strides = [1, 1, 1]} : vector<10x16x24xf32> to vector<8x16x24xf32>
    %82 = vector.shape_cast %81 : vector<8x16x24xf32> to vector<128x24xf32>
    %c2_33 = arith.constant 2 : index
    %c0_34 = arith.constant 0 : index
    %c0_35 = arith.constant 0 : index
    %83 = vector.load %arg5[%c2_33, %c0_34, %c0_35] : memref<3x24x8xf32, #tpu.memory_space<vmem>>, vector<1x24x8xf32>
    %84 = vector.shape_cast %83 : vector<1x24x8xf32> to vector<24x8xf32>
    %cst_36 = arith.constant dense<0.000000e+00> : vector<128x8xf32>
    %85 = tpu.matmul %82, %84, %cst_36 {dimension_numbers = #tpu.dot_dimension_numbers<[1], [0], [0], [1], [0, 0, 1, 1], [], []>} : vector<128x24xf32>, vector<24x8xf32>, vector<128x8xf32> -> vector<128x8xf32>
    %86 = arith.addf %80, %85 : vector<128x8xf32>
    %c0_37 = arith.constant 0 : index
    %c0_38 = arith.constant 0 : index
    %87 = vector.load %arg6[%c0_37, %c0_38] : memref<1x8xf32, #tpu.memory_space<vmem>>, vector<1x8xf32>
    %88 = vector.broadcast %87 : vector<1x8xf32> to vector<128x8xf32>
    %89 = arith.addf %86, %88 : vector<128x8xf32>
    %cst_39 = arith.constant 0.000000e+00 : f32
    %90 = vector.broadcast %cst_39 : f32 to vector<128x8xf32>
    %91 = arith.maximumf %89, %90 : vector<128x8xf32>
    %92 = vector.extract_strided_slice %5 {offsets = [2, 0, 0], sizes = [8, 16, 8], strides = [1, 1, 1]} : vector<12x16x8xf32> to vector<8x16x8xf32>
    %93 = vector.shape_cast %92 : vector<8x16x8xf32> to vector<128x8xf32>
    %94 = arith.addf %91, %93 : vector<128x8xf32>
    %95 = vector.shape_cast %94 : vector<128x8xf32> to vector<8x16x8xf32>
    %c0_40 = arith.constant 0 : index
    %c0_41 = arith.constant 0 : index
    %c0_42 = arith.constant 0 : index
    %c0_43 = arith.constant 0 : index
    %96 = vector.load %arg7[%c0_40, %c0_41, %c0_42, %c0_43] : memref<1x8x16x8xf32, #tpu.memory_space<vmem>>, vector<1x8x16x8xf32>
    %97 = vector.shape_cast %96 : vector<1x8x16x8xf32> to vector<8x16x8xf32>
    %98 = vector.shape_cast %95 : vector<8x16x8xf32> to vector<1x8x16x8xf32>
    tpu.vector_store %arg7[%c0_40, %c0_41, %c0_42, %c0_43], %98 {strides = array<i32>} : memref<1x8x16x8xf32, #tpu.memory_space<vmem>>, vector<1x8x16x8xf32>,
    return
  }
  func.func @transform_0(%arg0: i32, %arg1: i32) -> (i32, i32, i32, i32) {
    %c0_i32 = arith.constant 0 : i32
    %c0_i32_0 = arith.constant 0 : i32
    %c0_i32_1 = arith.constant 0 : i32
    %c0_i32_2 = arith.constant 0 : i32
    return %arg0, %c0_i32, %c0_i32_0, %c0_i32_1 : i32, i32, i32, i32
  }
  func.func @transform_1(%arg0: i32, %arg1: i32) -> (i32, i32, i32) {
    %c0_i32 = arith.constant 0 : i32
    %c0_i32_0 = arith.constant 0 : i32
    %c0_i32_1 = arith.constant 0 : i32
    %c0_i32_2 = arith.constant 0 : i32
    return %c0_i32, %c0_i32_0, %c0_i32_1 : i32, i32, i32
  }
  func.func @transform_2(%arg0: i32, %arg1: i32) -> (i32, i32) {
    %c0_i32 = arith.constant 0 : i32
    %c0_i32_0 = arith.constant 0 : i32
    %c0_i32_1 = arith.constant 0 : i32
    return %c0_i32, %c0_i32_0 : i32, i32
  }
  func.func @transform_3(%arg0: i32, %arg1: i32) -> (i32, i32, i32) {
    %c0_i32 = arith.constant 0 : i32
    %c0_i32_0 = arith.constant 0 : i32
    %c0_i32_1 = arith.constant 0 : i32
    %c0_i32_2 = arith.constant 0 : i32
    return %c0_i32, %c0_i32_0, %c0_i32_1 : i32, i32, i32
  }
  func.func @transform_4(%arg0: i32, %arg1: i32) -> (i32, i32) {
    %c0_i32 = arith.constant 0 : i32
    %c0_i32_0 = arith.constant 0 : i32
    %c0_i32_1 = arith.constant 0 : i32
    return %c0_i32, %c0_i32_0 : i32, i32
  }
  func.func @transform_5(%arg0: i32, %arg1: i32) -> (i32, i32, i32, i32) {
    %c0_i32 = arith.constant 0 : i32
    %c0_i32_0 = arith.constant 0 : i32
    %c0_i32_1 = arith.constant 0 : i32
    return %arg0, %arg1, %c0_i32, %c0_i32_0 : i32, i32, i32, i32
  }
}

</mosaic_0001>

<bundles_post_ra>
// kernel: basic_block_3x3_reverse.1
= control target key start
LH: loop header
LB: loop body
LE: loop exit
PB: predicated region body
PF: predicated region fallthrough
CT: control target
= control target key end

     0   :  { %s3085_s18 = smov 0   ;;  %s3087_s19 = smov 0   ;;  %s4355_s0 = inlined_call_operand.vmem [shape: f32[2,20,16,8], index: 0, kind: input, shape index: {}]   ;;  %s4356_s1 = inlined_call_operand.vmem [shape: f32[3,24,8], index: 1, kind: input, shape index: {}]   ;;  %s4357_s2 = inlined_call_operand.vmem [shape: f32[1,8], index: 2, kind: input, shape index: {}]   ;;  %s4358_s3 = inlined_call_operand.vmem [shape: f32[3,24,8], index: 3, kind: input, shape index: {}]   ;;  %s4359_s4 = inlined_call_operand.vmem [shape: f32[1,8], index: 4, kind: input, shape index: {}]   ;;  %s4360_s5 = inlined_call_operand.vmem [shape: f32[2,16,16,8], index: 5, kind: output, shape index: {}]  }
   0x1   :  { %s3089_s20 = smov 0   ;;  %s3091_s21 = smov 0  }
   0x2   :  { %s3093_s22 = smov 0  }
   0x3 LB: > { %s24_s23 = sadd.s32 1, %s3043_s20  ;;  %s27_s24 = sadd.s32 1, %s3047_s21  ;;  %s3051_s22 = sphi %s3093_s22, %s15_s22   ;;  %s3047_s21 = sphi %s3091_s21, %s4382_s21   ;;  %s3043_s20 = sphi %s3089_s20, %s4381_s20   ;;  %s3039_s19 = sphi %s3087_s19, %s4380_s19   ;;  %s3035_s18 = sphi %s3085_s18, %s4379_s18  }
   0x4   : > { %p25_p0 = scmp.ge.s32.totalorder %s24_s23, 2  ;;  %p2396_p1 = scmp.ge.s32.totalorder %s3051_s22, 1 }
   0x5   : > { %p201_p2 = scmp.lt.s32.totalorder %s3051_s22, 5 }
   0x6   : > { %s4384_s23 = smov (%p25_p0, %s24_s23), 0  ;;  %s4386_s24 = smov (!%p25_p0, %s27_s24), %s3047_s21 }
   0x7   : > { %p202_p3 = pnand %p2396_p1, %p201_p2  ;;  %p29_p4 = scmp.ge.s32.totalorder %s4386_s24, 2 }
   0x8   : > { %p234_p5 = scmp.lt.s32.totalorder (!%p202_p3), %s3039_s19, 1  ;;  %v2404_v0 = vld [vmem:[%s4356_s1 + $0x18] sm:$0xff] (!%p202_p3)  ;;  %v2405_v1 = vld [vmem:[%s4356_s1 + $0x20] sm:$0xff] (!%p202_p3)  ;;  %v251_v2 = vlaneseq (!%p202_p3)  ;;  %v2406_v4 = vld [vmem:[%s4356_s1 + $0x28] sm:$0xff] (!%p202_p3)  ;;  %s2529_s7 = sshll.u32 (!%p202_p3), %s3035_s18, 7  ;;  %vm630_vm4 = vcmask (!%p202_p3), 64512  }
   0x9   : > { %s4388_s24 = smov (%p29_p4, %s4386_s24), 0  ;;  %205 = sbr.rel (%p202_p3) target bundleno = 920 (0x398), region = 40 }
   0xa   : > { %v2854_v3 = vpack.c.bf16 (!%p202_p3), %v2405_v1, %v2404_v0  ;;  %v3130_v5 = vshrl.u32 (!%p202_p3), %v251_v2, 7  ;;  %s3053_s12 = smov (!%p202_p3), 8   ;;  %s3054_s13 = smov (!%p202_p3), 16   ;;  %v680_v36 = vld [vmem:[%s4356_s1] sm:$0xff] (!%p202_p3)  ;;  %v681_v37 = vld [vmem:[%s4356_s1 + $0x8] sm:$0xff] (!%p202_p3)  ;;  %vm655_vm5 = vcmask (!%p202_p3), 130048  }
   0xb   : > { %v3225_v41 = vpack.c.bf16 (!%p202_p3), %v681_v37, %v680_v36  ;;  %vm687_vm6 = vcmask (!%p202_p3), 195584   ;;  %s3683_s8 = sshll.u32 (!%p202_p3), %s3035_s18, 3 }
   0xc   : > { %2855 = vmatprep.subr.bf16.mxu0 (!%p202_p3), %v2854_v3  ;;  %2878 = vmatprep.subr.bf16.mxu1 (!%p202_p3), %v2854_v3  ;;  %v3138_v6 = vadd.s32 (!%p202_p3), 8, %v3130_v5  ;;  %vm385_vm0 = vcmp.lt.s32.totalorder (!%p202_p3), %v3130_v5, 7  ;;  %vm306_vm2 = vcmp.lt.s32.totalorder (!%p202_p3), %v3130_v5, 1  ;;  %vm280_vm3 = vcmp.ge.s32.totalorder (!%p202_p3), %v3130_v5, 1  ;;  %s2471_s9 = sadd.s32 (!%p202_p3), 4294967295, %s3683_s8  ;;  %p242_p6 = scmp.lt.s32.totalorder (!%p202_p3), %s3683_s8, 15 }
   0xd   : > { %2857 = vmatpush3.bf16.msra.mxu0 (!%p202_p3), %v2854_v3  ;;  %2880 = vmatpush3.bf16.msra.mxu1 (!%p202_p3), %v2854_v3  ;;  %v4269_v5 = vld [vmem:[%s4359_s4] ss:$0 sm:$0xff] (!%p202_p3) }
   0xe   : > { %2660 = vmatprep.subr.mxu0 (!%p202_p3), %v2406_v4  ;;  %2879 = vmatprep.subr.mxu1 (!%p202_p3), %v2406_v4  ;;  %vm360_vm1 = vcmp.lt.s32.totalorder (!%p202_p3), %v3138_v6, 15 }
  0x10   : > { %s4390_s19 = smov (!%p234_p5, %s3039_s19), 1  ;;  %s4392_s8 = smov (!%p242_p6, %s3683_s8), 15 }
  0x11   : > { %s2954_s6 = smul.u32 320, %s4390_s19  ;;  %2661 = vmatpush3.msra.mxu0 %v2406_v4  ;;  %2881 = vmatpush3.msra.mxu1 %v2406_v4  ;;  %s2399_s16 = sshll.u32 %s4392_s8, 1 }
  0x12   : > { %2859 = vmatprep.subr.bf16.mxu0 %v3225_v41  ;;  %s2400_s18 = sshll.u32 %s4390_s19, 5 }
  0x13   : > { %s238_s10 = scalar_lea.vmem %s4355_s0, %s2954_s6  ;;  %s246_s17 = sadd.s32 %s2400_s18, %s2399_s16 }
  0x14   : > { %s3135_s11 = scalar_lea.vmem %s238_s10, %s2529_s7  ;;  %s2401_s27 = sshll.u32 %s246_s17, 3 }
  0x15   : > { %v3141_v7 = vld [vmem:[%s3135_s11 + $0x28] sm:$0xff]  ;;  %v258_v8 = vld [vmem:[%s3135_s11 + $0x10] sm:$0xff]  ;;  %v259_v9 = vld [vmem:[%s3135_s11 + $0x18] sm:$0xff]  ;;  %s4276_s19 = scalar_lea.vmem %s4360_s5, %s2401_s27 }
  0x16   : > { %472 = vrot.lane.b32.xlu1 %v3141_v7, %s3053_s12  ;;  %466 = vrot.lane.b32.xlu0 %v258_v8, %s3053_s12  ;;  %v362_v10 = vrot.slane %v258_v8, 1  ;;  %v3150_v11 = vld [vmem:[%s3135_s11 + $0x20] sm:$0xff]  ;;  %v374_v12 = vrot.slane %v259_v9, 1  ;;  %v375_v14 = vrot.slane %v3141_v7, 1  ;;  %v3166_v19 = vld [vmem:[%s3135_s11 + $0x30] sm:$0xff]  ;;  %v283_v25 = vrot.slane %v258_v8, 7 }
  0x17   : > { %v363_v13 = vrot.slane %v3150_v11, 1  ;;  %v3169_v20 = vld [vmem:[%s3135_s11 + $0x38] sm:$0xff]  ;;  %v364_v23 = vrot.slane %v3166_v19, 1  ;;  %v295_v26 = vrot.slane %v259_v9, 7  ;;  %v3186_v28 = vld [vmem:[%s3135_s11 + $0x40] sm:$0xff]  ;;  %v3189_v29 = vld [vmem:[%s3135_s11 + $0x48] sm:$0xff] }
  0x18   : > { %v387_v15 = vsel %vm385_vm0, %v362_v10, %v374_v12  ;;  %v399_v16 = vsel %vm385_vm0, %v374_v12, %v362_v10  ;;  %v376_v24 = vrot.slane %v3169_v20, 1  ;;  %v365_v34 = vrot.slane %v3186_v28, 1  ;;  %v3220_v39 = vld [vmem:[%s3135_s11 + $0x50] sm:$0xff]  ;;  %v3223_v40 = vld [vmem:[%s3135_s11 + $0x58] sm:$0xff]  ;;  %v3243_v47 = vld [vmem:[%s3135_s11 + $0x60] sm:$0xff] }
  0x19   : > { %v417_v17 = vsel %vm360_vm1, %v399_v16, 0.0  ;;  %v400_v18 = vsel %vm385_vm0, %v375_v14, %v363_v13  ;;  %v388_v21 = vsel %vm385_vm0, %v363_v13, %v375_v14  ;;  %v3201_v32 = vsel %vm306_vm2, %v295_v26, %v283_v25  ;;  %v3246_v48 = vld [vmem:[%s3135_s11 + $0x68] sm:$0xff]  ;;  %v256_v54 = vld [vmem:[%s3135_s11] sm:$0xff]  ;;  %v3265_v58 = vld [vmem:[%s3135_s11 + $0x70] sm:$0xff] }
  0x1a   : > { %468 = vrot.lane.b32.xlu0 %v259_v9, %s3053_s12  ;;  %562 = vrot.lane.b32.xlu1 %v387_v15, %s3054_s13  ;;  %v419_v22 = vsel %vm360_vm1, %v400_v18, 0.0  ;;  %v401_v27 = vsel %vm385_vm0, %v376_v24, %v364_v23  ;;  %v389_v30 = vsel %vm385_vm0, %v364_v23, %v376_v24  ;;  %v3205_v33 = vsel %vm306_vm2, %v283_v25, %v295_v26  ;;  %v257_v53 = vld [vmem:[%s3135_s11 + $0x8] sm:$0xff]  ;;  %v3268_v59 = vld [vmem:[%s3135_s11 + $0x78] sm:$0xff] }
  0x1b   : > { %v421_v31 = vsel %vm360_vm1, %v401_v27, 0.0  ;;  %v377_v35 = vrot.slane %v3189_v29, 1  ;;  %v366_v44 = vrot.slane %v3220_v39, 1  ;;  %v378_v45 = vrot.slane %v3223_v40, 1  ;;  %v3305_v12 = vld [vmem:[%s3135_s11 + $0x80] sm:$0xff]  ;;  %v3308_v13 = vld [vmem:[%s3135_s11 + $0x88] sm:$0xff] }
  0x1c   : > { %v367_v51 = vrot.slane %v3243_v47, 1  ;;  %v379_v52 = vrot.slane %v3246_v48, 1  ;;  %v294_v55 = vrot.slane %v257_v53, 7  ;;  %v282_v56 = vrot.slane %v256_v54, 7 }
  0x1d   : > { %v402_v38 = vsel %vm385_vm0, %v377_v35, %v365_v34  ;;  %v390_v42 = vsel %vm385_vm0, %v365_v34, %v377_v35  ;;  %v403_v46 = vsel %vm385_vm0, %v378_v45, %v366_v44  ;;  %v391_v49 = vsel %vm385_vm0, %v366_v44, %v378_v45 }
  0x1e   : > { %470 = vrot.lane.b32.xlu0 %v3150_v11, %s3053_s12  ;;  %564 = vrot.lane.b32.xlu1 %v417_v17, %s3054_s13  ;;  %v423_v43 = vsel %vm360_vm1, %v402_v38, 0.0  ;;  %v425_v50 = vsel %vm360_vm1, %v403_v46, 0.0  ;;  %v404_v57 = vsel %vm385_vm0, %v379_v52, %v367_v51  ;;  %v392_v60 = vsel %vm385_vm0, %v367_v51, %v379_v52 }
  0x1f   : > { %v427_v61 = vsel %vm360_vm1, %v404_v57, 0.0  ;;  %v3280_v62 = vsel %vm306_vm2, %v294_v55, %v282_v56  ;;  %v368_v63 = vrot.slane %v3265_v58, 1  ;;  %v380_v0 = vrot.slane %v3268_v59, 1 }
  0x20   : > { %v3286_v1 = vsel %vm306_vm2, %v282_v56, %v294_v55  ;;  %v373_v8 = vrot.slane %v257_v53, 1  ;;  %v361_v9 = vrot.slane %v256_v54, 1  ;;  %v369_v16 = vrot.slane %v3305_v12, 1 }
  0x21   : > { %v405_v2 = vsel %vm385_vm0, %v380_v0, %v368_v63  ;;  %v393_v3 = vsel %vm385_vm0, %v368_v63, %v380_v0  ;;  %v381_v17 = vrot.slane %v3308_v13, 1  ;;  %v296_v63 = vrot.slane %v3141_v7, 7 }
  0x22   : > { %566 = vrot.lane.b32.xlu0 %v388_v21, %s3054_s13  ;;  %568 = vrot.lane.b32.xlu1 %v419_v22, %s3054_s13  ;;  %v429_v4 = vsel %vm360_vm1, %v405_v2, 0.0  ;;  %v398_v10 = vsel %vm385_vm0, %v373_v8, %v361_v9  ;;  %v386_v15 = vsel %vm385_vm0, %v361_v9, %v373_v8  ;;  %v3323_v21 = vld [vmem:[%s3135_s11 + $0x90] sm:$0xff]  ;;  %v3326_v22 = vld [vmem:[%s3135_s11 + $0x98] sm:$0xff]  ;;  %v284_v0 = vrot.slane %v3150_v11, 7 }
  0x23   : > { %v415_v14 = vsel %vm360_vm1, %v398_v10, 0.0  ;;  %v406_v18 = vsel %vm385_vm0, %v381_v17, %v369_v16  ;;  %v394_v23 = vsel %vm385_vm0, %v369_v16, %v381_v17  ;;  %v370_v25 = vrot.slane %v3323_v21, 1  ;;  %v682_v16 = vld [vmem:[%s4356_s1 + $0x10] sm:$0xff] }
  0x24   : > { %v431_v24 = vsel %vm360_vm1, %v406_v18, 0.0  ;;  %v382_v26 = vrot.slane %v3326_v22, 1  ;;  %v321_v9 = vsel %vm306_vm2, %v296_v63, %v284_v0  ;;  %v309_v11 = vsel %vm306_vm2, %v284_v0, %v296_v63 }
  0x25   : > { %v285_v17 = vrot.slane %v3166_v19, 7  ;;  %v297_v18 = vrot.slane %v3169_v20, 7 }
  0x26   : > { %474 = vrot.lane.b32.xlu0 %v3166_v19, %s3053_s12  ;;  %476 = vrot.lane.b32.xlu1 %v3169_v20, %s3053_s12  ;;  %v407_v27 = vsel %vm385_vm0, %v382_v26, %v370_v25  ;;  %v395_v34 = vsel %vm385_vm0, %v370_v25, %v382_v26 }
  0x27   : > { %v433_v35 = vsel %vm360_vm1, %v407_v27, 0.0 }
  0x2a   : > { %570 = vrot.lane.b32.xlu0 %v389_v30, %s3054_s13  ;;  %572 = vrot.lane.b32.xlu1 %v421_v31, %s3054_s13  ;;  %v276_v30 = vld [vmem:[%s3135_s11 + $0xa0] sm:$0xff]  ;;  %v277_v31 = vld [vmem:[%s3135_s11 + $0xa8] sm:$0xff] }
  0x2b   : > { %v371_v36 = vrot.slane %v276_v30, 1  ;;  %v383_v37 = vrot.slane %v277_v31, 1 }
  0x2d   : > { %v408_v38 = vsel %vm385_vm0, %v383_v37, %v371_v36  ;;  %v396_v44 = vsel %vm385_vm0, %v371_v36, %v383_v37  ;;  %v310_v36 = vsel %vm306_vm2, %v285_v17, %v297_v18  ;;  %v286_v37 = vrot.slane %v3186_v28, 7 }
  0x2e   : > { %478 = vrot.lane.b32.xlu0 %v3186_v28, %s3053_s12  ;;  %480 = vrot.lane.b32.xlu1 %v3189_v29, %s3053_s12  ;;  %v435_v45 = vsel %vm360_vm1, %v408_v38, 0.0  ;;  %v298_v38 = vrot.slane %v3189_v29, 7 }
  0x30   : > { %v323_v28 = vsel %vm306_vm2, %v298_v38, %v286_v37 }
  0x32   : > { %574 = vrot.lane.b32.xlu0 %v390_v42, %s3054_s13  ;;  %576 = vrot.lane.b32.xlu1 %v423_v43, %s3054_s13  ;;  %v3357_v42 = vld [vmem:[%s3135_s11 + $0xb0] sm:$0xff]  ;;  %v3360_v43 = vld [vmem:[%s3135_s11 + $0xb8] sm:$0xff] }
  0x33   : > { %v372_v46 = vrot.slane %v3357_v42, 1 }
  0x36   : > { %482 = vrot.lane.b32.xlu0 %v3220_v39, %s3053_s12  ;;  %484 = vrot.lane.b32.xlu1 %v3223_v40, %s3053_s12 }
  0x3a   : > { %578 = vrot.lane.b32.xlu0 %v391_v49, %s3054_s13  ;;  %580 = vrot.lane.b32.xlu1 %v425_v50, %s3054_s13  ;;  %v384_v49 = vrot.slane %v3360_v43, 1 }
  0x3c   : > { %v409_v50 = vsel %vm385_vm0, %v384_v49, %v372_v46  ;;  %v397_v51 = vsel %vm385_vm0, %v372_v46, %v384_v49 }
  0x3d   : > { %v437_v52 = vsel %vm360_vm1, %v409_v50, 0.0 }
  0x3e   : > { %486 = vrot.lane.b32.xlu0 %v3243_v47, %s3053_s12  ;;  %488 = vrot.lane.b32.xlu1 %v3246_v48, %s3053_s12 }
  0x42   : > { %582 = vrot.lane.b32.xlu0 %v392_v60, %s3054_s13  ;;  %584 = vrot.lane.b32.xlu1 %v427_v61, %s3054_s13  ;;  %v337_v61 = vsel %vm280_vm3, %v3201_v32, 0.0 }
  0x46   : > { %490 = vrot.lane.b32.xlu0 %v3265_v58, %s3053_s12  ;;  %492 = vrot.lane.b32.xlu1 %v3268_v59, %s3053_s12 }
  0x4a   : > { %586 = vrot.lane.b32.xlu0 %v393_v3, %s3054_s13  ;;  %588 = vrot.lane.b32.xlu1 %v429_v4, %s3054_s13 }
  0x4e   : > { %464 = vrot.lane.b32.xlu1 %v257_v53, %s3053_s12  ;;  %462 = vrot.lane.b32.xlu0 %v256_v54, %s3053_s12  ;;  %v292_v53 = vrot.slane %v276_v30, 7  ;;  %v304_v54 = vrot.slane %v277_v31, 7 }
  0x50   : > { %v3386_v55 = vsel %vm306_vm2, %v304_v54, %v292_v53  ;;  %v3390_v56 = vsel %vm306_vm2, %v292_v53, %v304_v54  ;;  %v343_v53 = vsel %vm280_vm3, %v323_v28, 0.0  ;;  %v311_v54 = vsel %vm306_vm2, %v286_v37, %v298_v38 }
  0x52   : > { %560 = vrot.lane.b32.xlu1 %v415_v14, %s3054_s13  ;;  %558 = vrot.lane.b32.xlu0 %v386_v15, %s3054_s13  ;;  %v339_v14 = vsel %vm280_vm3, %v321_v9, 0.0 }
  0x56   : > { %494 = vrot.lane.b32.xlu0 %v3305_v12, %s3053_s12  ;;  %496 = vrot.lane.b32.xlu1 %v3308_v13, %s3053_s12 }
  0x5a   : > { %590 = vrot.lane.b32.xlu0 %v394_v23, %s3054_s13  ;;  %592 = vrot.lane.b32.xlu1 %v431_v24, %s3054_s13  ;;  %v2448_v23 = vld [vmem:[%s4356_s1 + $0x38] sm:$0xff] }
  0x5e   : > { %498 = vrot.lane.b32.xlu0 %v3323_v21, %s3053_s12  ;;  %500 = vrot.lane.b32.xlu1 %v3326_v22, %s3053_s12 }
  0x62   : > { %594 = vrot.lane.b32.xlu0 %v395_v34, %s3054_s13  ;;  %596 = vrot.lane.b32.xlu1 %v433_v35, %s3054_s13 }
  0x66   : > { %502 = vrot.lane.b32.xlu0 %v276_v30, %s3053_s12  ;;  %504 = vrot.lane.b32.xlu1 %v277_v31, %s3053_s12 }
  0x6a   : > { %598 = vrot.lane.b32.xlu0 %v396_v44, %s3054_s13  ;;  %600 = vrot.lane.b32.xlu1 %v435_v45, %s3054_s13 }
  0x6e   : > { %506 = vrot.lane.b32.xlu0 %v3357_v42, %s3053_s12  ;;  %508 = vrot.lane.b32.xlu1 %v3360_v43, %s3053_s12 }
  0x72   : > { %602 = vrot.lane.b32.xlu0 %v397_v51, %s3054_s13  ;;  %604 = vrot.lane.b32.xlu1 %v437_v52, %s3054_s13 }
  0x88   : > { %v473_v57 = vpop.permute.xlu1 %472  ;;  %v467_v60 = vpop.permute.xlu0 %466 }
  0x89   : > { %v633_v2 = vsel %vm630_vm4, %v337_v61, %v467_v60  ;;  %v636_v24 = vsel %vm630_vm4, %v309_v11, %v473_v57  ;;  %v287_v57 = vrot.slane %v3220_v39, 7  ;;  %v299_v60 = vrot.slane %v3223_v40, 7 }
  0x8a   : > { %v300_v11 = vrot.slane %v3246_v48, 7 }
  0x8b   : > { %v324_v39 = vsel %vm306_vm2, %v299_v60, %v287_v57 }
  0x8c   : > { %v469_v3 = vpop.permute.xlu0 %468  ;;  %v563_v4 = vpop.permute.xlu1 %562 }
  0x8d   : > { %v3400_v8 = vsel %vm655_vm5, %v633_v2, %v563_v4  ;;  %v634_v32 = vsel %vm630_vm4, %v3205_v33, %v469_v3  ;;  %v2447_v33 = vld [vmem:[%s4356_s1 + $0x30] sm:$0xff] }
  0x8e   : > { %2662 = vmatprep.mubr.msk.f32.mxu0 %vm687_vm6, %v3400_v8  ;;  %v3437_v30 = vpack.c.bf16 %v2448_v23, %v2447_v33 }
  0x90   : > { %v471_v10 = vpop.permute.xlu0 %470  ;;  %v565_v7 = vpop.permute.xlu1 %564 }
  0x91   : > { %v3413_v15 = vsel %vm655_vm5, %v634_v32, %v565_v7  ;;  %v635_v25 = vsel %vm630_vm4, %v339_v14, %v471_v10  ;;  %v345_v32 = vsel %vm280_vm3, %v324_v39, 0.0  ;;  %v312_v10 = vsel %vm306_vm2, %v287_v57, %v299_v60 }
  0x92   : > { %2663 = vmatmul.mubr.msk.f32.vlgmr.msra.gmra.mrb[0].mxu0 %vm687_vm6, %v3413_v15  ;;  %v288_v7 = vrot.slane %v3243_v47, 7  ;;  %v290_v57 = vrot.slane %v3305_v12, 7  ;;  %v302_v60 = vrot.slane %v3308_v13, 7 }
  0x93   : > { %2861 = vmatpush3.bf16.msra.mxu0 %v3225_v41  ;;  %v322_v41 = vsel %vm306_vm2, %v297_v18, %v285_v17 }
  0x94   : > { %v567_v19 = vpop.permute.xlu0 %566  ;;  %v569_v26 = vpop.permute.xlu1 %568  ;;  %2696 = vmatprep.subr.mxu0 %v682_v16  ;;  %v341_v35 = vsel %vm280_vm3, %v322_v41, 0.0  ;;  %v325_v47 = vsel %vm306_vm2, %v300_v11, %v288_v7  ;;  %v301_v41 = vrot.slane %v3268_v59, 7 }
  0x95   : > { %v3432_v20 = vsel %vm655_vm5, %v635_v25, %v567_v19  ;;  %v3435_v27 = vsel %vm655_vm5, %v636_v24, %v569_v26  ;;  %v347_v25 = vsel %vm280_vm3, %v325_v47, 0.0  ;;  %v313_v19 = vsel %vm306_vm2, %v288_v7, %v300_v11 }
  0x96   : > { %2665 = vmatprep.mubr.msk.f32.mxu0 %vm687_vm6, %v3432_v20  ;;  %v289_v26 = vrot.slane %v3265_v58, 7  ;;  %v291_v7 = vrot.slane %v3323_v21, 7  ;;  %v303_v11 = vrot.slane %v3326_v22, 7 }
  0x97   : > { %2666 = vmatmul.mubr.msk.f32.gmra.mrb[2].mxu0 %vm687_vm6, %v3435_v27 }
  0x98   : > { %v475_v31 = vpop.permute.xlu0 %474  ;;  %v477_v34 = vpop.permute.xlu1 %476  ;;  %2697 = vmatpush3.msra.mxu0 %v682_v16  ;;  %v326_v58 = vsel %vm306_vm2, %v301_v41, %v289_v26 }
  0x99   : > { %2863 = vmatprep.subr.bf16.mxu0 %v3437_v30  ;;  %v637_v44 = vsel %vm630_vm4, %v341_v35, %v475_v31  ;;  %v638_v45 = vsel %vm630_vm4, %v310_v36, %v477_v34 }
  0x9c   : > { %v571_v46 = vpop.permute.xlu0 %570  ;;  %v573_v49 = vpop.permute.xlu1 %572 }
  0x9d   : > { %v3455_v50 = vsel %vm655_vm5, %v637_v44, %v571_v46  ;;  %v3458_v51 = vsel %vm655_vm5, %v638_v45, %v573_v49  ;;  %v349_v45 = vsel %vm280_vm3, %v326_v58, 0.0  ;;  %v314_v46 = vsel %vm306_vm2, %v289_v26, %v301_v41 }
  0x9e   : > { %2668 = vmatprep.mubr.msk.f32.mxu0 %vm687_vm6, %v3455_v50 }
  0x9f   : > { %2669 = vmatmul.mubr.msk.f32.gmra.mrb[4].mxu0 %vm687_vm6, %v3458_v51 }
  0xa0   : > { %v479_v29 = vpop.permute.xlu0 %478  ;;  %v481_v52 = vpop.permute.xlu1 %480 }
  0xa1   : > { %v639_v61 = vsel %vm630_vm4, %v343_v53, %v479_v29  ;;  %v640_v63 = vsel %vm630_vm4, %v311_v54, %v481_v52 }
  0xa4   : > { %v575_v0 = vpop.permute.xlu0 %574  ;;  %v577_v2 = vpop.permute.xlu1 %576 }
  0xa5   : > { %v3475_v3 = vsel %vm655_vm5, %v639_v61, %v575_v0  ;;  %v3478_v4 = vsel %vm655_vm5, %v640_v63, %v577_v2  ;;  %v335_v0 = vsel %vm280_vm3, %v3280_v62, 0.0  ;;  %v2449_v62 = vld [vmem:[%s4356_s1 + $0x40] sm:$0xff] }
  0xa6   : > { %2671 = vmatprep.mubr.msk.f32.mxu0 %vm687_vm6, %v3475_v3 }
  0xa7   : > { %2672 = vmatmul.mubr.msk.f32.gmra.mrb[6].mxu0 %vm687_vm6, %v3478_v4 }
  0xa8   : > { %v483_v40 = vpop.permute.xlu0 %482  ;;  %v485_v9 = vpop.permute.xlu1 %484 }
  0xa9   : > { %v641_v14 = vsel %vm630_vm4, %v345_v32, %v483_v40  ;;  %v642_v16 = vsel %vm630_vm4, %v312_v10, %v485_v9  ;;  %v327_v32 = vsel %vm306_vm2, %v302_v60, %v290_v57  ;;  %v315_v10 = vsel %vm306_vm2, %v290_v57, %v302_v60 }
  0xac   : > { %v579_v17 = vpop.permute.xlu0 %578  ;;  %v581_v18 = vpop.permute.xlu1 %580 }
  0xad   : > { %v3495_v33 = vsel %vm655_vm5, %v641_v14, %v579_v17  ;;  %v3498_v23 = vsel %vm655_vm5, %v642_v16, %v581_v18 }
  0xae   : > { %2674 = vmatprep.mubr.msk.f32.mxu0 %vm687_vm6, %v3495_v33 }
  0xaf   : > { %2675 = vmatmul.mubr.msk.f32.gmra.mrb[8].mxu0 %vm687_vm6, %v3498_v23 }
  0xb0   : > { %v487_v48 = vpop.permute.xlu0 %486  ;;  %v489_v24 = vpop.permute.xlu1 %488 }
  0xb1   : > { %v643_v31 = vsel %vm630_vm4, %v347_v25, %v487_v48  ;;  %v644_v34 = vsel %vm630_vm4, %v313_v19, %v489_v24  ;;  %v316_v48 = vsel %vm306_vm2, %v291_v7, %v303_v11 }
  0xb4   : > { %v583_v35 = vpop.permute.xlu0 %582  ;;  %v585_v36 = vpop.permute.xlu1 %584 }
  0xb5   : > { %v3515_v37 = vsel %vm655_vm5, %v643_v31, %v583_v35  ;;  %v3518_v38 = vsel %vm655_vm5, %v644_v34, %v585_v36  ;;  %v355_v36 = vsel %vm280_vm3, %v3386_v55, 0.0 }
  0xb6   : > { %2677 = vmatprep.mubr.msk.f32.mxu0 %vm687_vm6, %v3515_v37 }
  0xb7   : > { %2678 = vmatmul.mubr.msk.f32.gmra.mrb[10].mxu0 %vm687_vm6, %v3518_v38 }
  0xb8   : > { %v491_v59 = vpop.permute.xlu0 %490  ;;  %v493_v44 = vpop.permute.xlu1 %492 }
  0xb9   : > { %v645_v49 = vsel %vm630_vm4, %v349_v45, %v491_v59  ;;  %v646_v28 = vsel %vm630_vm4, %v314_v46, %v493_v44 }
  0xbc   : > { %v587_v29 = vpop.permute.xlu0 %586  ;;  %v589_v52 = vpop.permute.xlu1 %588 }
  0xbd   : > { %v3533_v53 = vsel %vm655_vm5, %v645_v49, %v587_v29  ;;  %v3536_v54 = vsel %vm655_vm5, %v646_v28, %v589_v52 }
  0xbe   : > { %2680 = vmatprep.mubr.msk.f32.mxu0 %vm687_vm6, %v3533_v53 }
  0xbf   : > { %2681 = vmatmul.mubr.msk.f32.gmra.mrb[12].mxu0 %vm687_vm6, %v3536_v54 }
  0xc0   : > { %v465_v61 = vpop.permute.xlu1 %464  ;;  %v463_v63 = vpop.permute.xlu0 %462 }
  0xc1   : > { %v632_v2 = vsel %vm630_vm4, %v3286_v1, %v465_v61  ;;  %v631_v39 = vsel %vm630_vm4, %v335_v0, %v463_v63  ;;  %v351_v1 = vsel %vm280_vm3, %v327_v32, 0.0  ;;  %v3686_v61 = vstv %s2471_s9  ;;  %v2472_v63 = vld [vmem:[%s4358_s3 + $0x18] sm:$0xff]  ;;  %v2473_v0 = vld [vmem:[%s4358_s3 + $0x20] sm:$0xff] }
  0xc2   : > { %vm1317_vm7 = vcmp.ge.s32.totalorder %v3686_v61, 0  ;;  %vm1327_vm8 = vcmp.lt.s32.totalorder %v3686_v61, 16 }
  0xc3   : > { %vm3702_vm9 = vmand %vm1317_vm7, %vm1327_vm8 }
  0xc4   : > { %v561_v40 = vpop.permute.xlu1 %560  ;;  %v559_v9 = vpop.permute.xlu0 %558 }
  0xc5   : > { %v657_v12 = vsel %vm655_vm5, %v632_v2, %v561_v40  ;;  %v656_v13 = vsel %vm655_vm5, %v631_v39, %v559_v9  ;;  %v1308_v2 = vadd.s32 1, %v3686_v61  ;;  %v2866_v39 = vpack.c.bf16 %v2473_v0, %v2472_v63  ;;  %v3700_v40 = vld [vmem:[%s4357_s2] ss:$0 sm:$0xff] }
  0xc6   : > { %2698 = vmatprep.mubr.msk.f32.mxu0 %vm687_vm6, %v656_v13 }
  0xc7   : > { %2699 = vmatmul.mubr.msk.f32.vlgmr.msra.gmra.mrb[0].mxu0 %vm687_vm6, %v657_v12  ;;  %2867 = vmatprep.subr.bf16.mxu1 %v2866_v39  ;;  %v1309_v12 = vadd.s32 2, %v3686_v61  ;;  %vm1318_vm10 = vcmp.ge.s32.totalorder %v1308_v2, 0  ;;  %vm1328_vm11 = vcmp.lt.s32.totalorder %v1308_v2, 16  ;;  %v1313_v2 = vadd.s32 6, %v3686_v61 }
  0xc8   : > { %2865 = vmatpush3.bf16.msra.mxu0 %v3437_v30  ;;  %2701 = vmatprep.mubr.msk.f32.mxu0 %vm687_vm6, %v3400_v8  ;;  %v495_v14 = vpop.permute.xlu0 %494  ;;  %v497_v16 = vpop.permute.xlu1 %496  ;;  %v328_v30 = vsel %vm306_vm2, %v303_v11, %v291_v7  ;;  %v1310_v7 = vadd.s32 3, %v3686_v61  ;;  %vm3718_vm12 = vmand %vm1318_vm10, %vm1328_vm11 }
  0xc9   : > { %2732 = vmatprep.subr.mxu0 %v2449_v62  ;;  %v647_v17 = vsel %vm630_vm4, %v351_v1, %v495_v14  ;;  %v648_v18 = vsel %vm630_vm4, %v315_v10, %v497_v16  ;;  %v2474_v1 = vld [vmem:[%s4358_s3 + $0x28] sm:$0xff]  ;;  %vm1319_vm13 = vcmp.ge.s32.totalorder %v1309_v12, 0  ;;  %vm1329_vm14 = vcmp.lt.s32.totalorder %v1309_v12, 16 }
  0xca   : > { %vm1320_vm15 = vcmp.ge.s32.totalorder %v1310_v7, 0  ;;  %vm3744_vm7 = vmand %vm1319_vm13, %vm1329_vm14  ;;  %vm1330_vm8 = vcmp.lt.s32.totalorder %v1310_v7, 16 }
  0xcb   : > { %2702 = vmatmul.mubr.msk.f32.gmra.mrb[2].mxu0 %vm687_vm6, %v3413_v15  ;;  %v353_v15 = vsel %vm280_vm3, %v328_v30, 0.0  ;;  %vm3771_vm10 = vmand %vm1320_vm15, %vm1330_vm8  ;;  %vm1323_vm15 = vcmp.ge.s32.totalorder %v1313_v2, 0  ;;  %vm1333_vm8 = vcmp.lt.s32.totalorder %v1313_v2, 16 }
  0xcc   : > { %2704 = vmatprep.mubr.msk.f32.mxu0 %vm687_vm6, %v3432_v20  ;;  %2733 = vmatpush3.msra.mxu0 %v2449_v62  ;;  %v591_v21 = vpop.permute.xlu0 %590  ;;  %v593_v22 = vpop.permute.xlu1 %592 }
  0xcd   : > { %v673_v8 = vsel %vm655_vm5, %v648_v18, %v593_v22  ;;  %v672_v47 = vsel %vm655_vm5, %v647_v17, %v591_v21 }
  0xce   : > { %2683 = vmatprep.mubr.msk.f32.mxu1 %vm687_vm6, %v672_v47 }
  0xcf   : > { %2705 = vmatmul.mubr.msk.f32.gmra.mrb[4].mxu0 %vm687_vm6, %v3435_v27  ;;  %2684 = vmatmul.mubr.msk.f32.vlgmr.msra.gmra.mrb[0].mxu1 %vm687_vm6, %v673_v8 }
  0xd0   : > { %2707 = vmatprep.mubr.msk.f32.mxu0 %vm687_vm6, %v3455_v50  ;;  %v499_v24 = vpop.permute.xlu0 %498  ;;  %v501_v25 = vpop.permute.xlu1 %500  ;;  %2869 = vmatpush3.bf16.msra.mxu1 %v2866_v39 }
  0xd1   : > { %v649_v19 = vsel %vm630_vm4, %v353_v15, %v499_v24  ;;  %v650_v26 = vsel %vm630_vm4, %v316_v48, %v501_v25  ;;  %2768 = vmatprep.subr.mxu1 %v2474_v1  ;;  %v1311_v48 = vadd.s32 4, %v3686_v61 }
  0xd3   : > { %2708 = vmatmul.mubr.msk.f32.gmra.mrb[6].mxu0 %vm687_vm6, %v3458_v51  ;;  %vm1331_vm11 = vcmp.lt.s32.totalorder %v1311_v48, 16 }
  0xd4   : > { %2710 = vmatprep.mubr.msk.f32.mxu0 %vm687_vm6, %v3475_v3  ;;  %v595_v41 = vpop.permute.xlu0 %594  ;;  %v597_v31 = vpop.permute.xlu1 %596  ;;  %2769 = vmatpush3.msra.mxu1 %v2474_v1 }
  0xd5   : > { %v674_v34 = vsel %vm655_vm5, %v649_v19, %v595_v41  ;;  %v675_v35 = vsel %vm655_vm5, %v650_v26, %v597_v31 }
  0xd6   : > { %2686 = vmatprep.mubr.msk.f32.mxu1 %vm687_vm6, %v674_v34 }
  0xd7   : > { %2711 = vmatmul.mubr.msk.f32.gmra.mrb[8].mxu0 %vm687_vm6, %v3478_v4  ;;  %2687 = vmatmul.mubr.msk.f32.gmra.mrb[2].mxu1 %vm687_vm6, %v675_v35 }
  0xd8   : > { %2713 = vmatprep.mubr.msk.f32.mxu0 %vm687_vm6, %v3495_v33  ;;  %v503_v58 = vpop.permute.xlu0 %502  ;;  %v505_v59 = vpop.permute.xlu1 %504 }
  0xd9   : > { %v651_v44 = vsel %vm630_vm4, %v355_v36, %v503_v58  ;;  %v652_v45 = vsel %vm630_vm4, %v3390_v56, %v505_v59  ;;  %v293_v56 = vrot.slane %v3357_v42, 7 }
  0xdb   : > { %2714 = vmatmul.mubr.msk.f32.gmra.mrb[10].mxu0 %vm687_vm6, %v3498_v23 }
  0xdc   : > { %2716 = vmatprep.mubr.msk.f32.mxu0 %vm687_vm6, %v3515_v37  ;;  %v599_v46 = vpop.permute.xlu0 %598  ;;  %v601_v55 = vpop.permute.xlu1 %600 }
  0xdd   : > { %v676_v49 = vsel %vm655_vm5, %v651_v44, %v599_v46  ;;  %v677_v28 = vsel %vm655_vm5, %v652_v45, %v601_v55  ;;  %v1312_v55 = vadd.s32 5, %v3686_v61 }
  0xde   : > { %2689 = vmatprep.mubr.msk.f32.mxu1 %vm687_vm6, %v676_v49 }
  0xdf   : > { %2717 = vmatmul.mubr.msk.f32.gmra.mrb[12].mxu0 %vm687_vm6, %v3518_v38  ;;  %2690 = vmatmul.mubr.msk.f32.gmra.mrb[4].mxu1 %vm687_vm6, %v677_v28  ;;  %vm1332_vm14 = vcmp.lt.s32.totalorder %v1312_v55, 16 }
  0xe0   : > { %2719 = vmatprep.mubr.msk.f32.mxu0 %vm687_vm6, %v3533_v53  ;;  %v509_v42 = vpop.permute.xlu1 %508 }
  0xe3   : > { %2720 = vmatmul.mubr.msk.f32.gmra.mrb[14].mxu0 %vm687_vm6, %v3536_v54 }
  0xe4   : > { %2722 = vmatprep.mubr.msk.f32.mxu0 %vm687_vm6, %v672_v47 }
  0xe7   : > { %2723 = vmatmul.mubr.msk.f32.gmra.mrb[16].mxu0 %vm687_vm6, %v673_v8 }
  0xe8   : > { %2725 = vmatprep.mubr.msk.f32.mxu0 %vm687_vm6, %v674_v34 }
  0xeb   : > { %2726 = vmatmul.mubr.msk.f32.gmra.mrb[18].mxu0 %vm687_vm6, %v675_v35 }
  0xec   : > { %2734 = vmatprep.mubr.msk.f32.mxu0 %vm687_vm6, %v3432_v20  ;;  %v305_v20 = vrot.slane %v3360_v43, 7 }
  0xef   : > { %2735 = vmatmul.mubr.msk.f32.vlgmr.msra.gmra.mrb[0].mxu0 %vm687_vm6, %v3435_v27  ;;  %v330_v27 = vsel %vm306_vm2, %v305_v20, %v293_v56 }
  0xf0   : > { %2737 = vmatprep.mubr.msk.f32.mxu0 %vm687_vm6, %v3455_v50  ;;  %v507_v50 = vpop.permute.xlu0 %506 }
  0xf3   : > { %2738 = vmatmul.mubr.msk.f32.gmra.mrb[2].mxu0 %vm687_vm6, %v3458_v51  ;;  %v357_v51 = vsel %vm280_vm3, %v330_v27, 0.0 }
  0xf4   : > { %2740 = vmatprep.mubr.msk.f32.mxu0 %vm687_vm6, %v3475_v3  ;;  %v653_v43 = vsel %vm630_vm4, %v357_v51, %v507_v50  ;;  %v318_v3 = vsel %vm306_vm2, %v293_v56, %v305_v20 }
  0xf7   : > { %2741 = vmatmul.mubr.msk.f32.gmra.mrb[4].mxu0 %vm687_vm6, %v3478_v4  ;;  %v603_v4 = vpop.permute.xlu0 %602 }
  0xf8   : > { %2743 = vmatprep.mubr.msk.f32.mxu0 %vm687_vm6, %v3495_v33  ;;  %v654_v33 = vsel %vm630_vm4, %v318_v3, %v509_v42 }
  0xfb   : > { %2744 = vmatmul.mubr.msk.f32.gmra.mrb[6].mxu0 %vm687_vm6, %v3498_v23  ;;  %v678_v23 = vsel %vm655_vm5, %v653_v43, %v603_v4 }
  0xfc   : > { %2746 = vmatprep.mubr.msk.f32.mxu0 %vm687_vm6, %v3515_v37  ;;  %v605_v37 = vpop.permute.xlu1 %604 }
  0xff   : > { %2747 = vmatmul.mubr.msk.f32.gmra.mrb[8].mxu0 %vm687_vm6, %v3518_v38  ;;  %v679_v38 = vsel %vm655_vm5, %v654_v33, %v605_v37 }
 0x100   : > { %2749 = vmatprep.mubr.msk.f32.mxu0 %vm687_vm6, %v3533_v53 }
 0x103   : > { %2750 = vmatmul.mubr.msk.f32.gmra.mrb[10].mxu0 %vm687_vm6, %v3536_v54 }
 0x104   : > { %2752 = vmatprep.mubr.msk.f32.mxu0 %vm687_vm6, %v672_v47 }
 0x107   : > { %2753 = vmatmul.mubr.msk.f32.gmra.mrb[12].mxu0 %vm687_vm6, %v673_v8 }
 0x108   : > { %2755 = vmatprep.mubr.msk.f32.mxu0 %vm687_vm6, %v674_v34 }
 0x10b   : > { %2756 = vmatmul.mubr.msk.f32.gmra.mrb[14].mxu0 %vm687_vm6, %v675_v35 }
 0x10c   : > { %2758 = vmatprep.mubr.msk.f32.mxu0 %vm687_vm6, %v676_v49 }
 0x10f   : > { %2759 = vmatmul.mubr.msk.f32.gmra.mrb[16].mxu0 %vm687_vm6, %v677_v28 }
 0x110   : > { %2761 = vmatprep.mubr.msk.f32.mxu0 %vm687_vm6, %v678_v23 }
 0x113   : > { %2762 = vmatmul.mubr.msk.f32.gmra.mrb[18].mxu0 %vm687_vm6, %v679_v38 }
 0x1a2   : > { %v3670_v29 = vpop.f32.mrb[0].mxu1 }
 0x1a3   : > { %v3672_v52 = vpop.f32.mrb[1].mxu1 }
 0x1aa   : > { %v3674_v53 = vpop.f32.mrb[2].mxu1 }
 0x1ab   : > { %v3676_v54 = vpop.f32.mrb[3].mxu1 }
 0x1b2   : > { %v3678_v57 = vpop.f32.mrb[4].mxu1 }
 0x1b3   : > { %v3680_v60 = vpop.f32.mrb[5].mxu1 }
 0x1c2   : > { %v2736_v9 = vpop.f32.mrb[0].mxu0 }
 0x1c3   : > { %v1287_v13 = vadd.f32 %v2736_v9, %v3700_v40  ;;  %v1160_v62 = vpop.f32.mrb[1].mxu0 }
 0x1c4   : > { %v1286_v10 = vadd.f32 %v3700_v40, %v1160_v62 }
 0x1c5   : > { %v1368_v11 = vsel %vm3702_vm9, %v1287_v13, 0.0 }
 0x1c6   : > { %1529 = vrot.lane.b32.xlu1 %v1368_v11, %s3053_s12  ;;  %v1397_v14 = vrot.slane %v1368_v11, 7  ;;  %v1457_v16 = vrot.slane %v1368_v11, 1  ;;  %v2739_v17 = vpop.f32.mrb[2].mxu0  ;;  %v1367_v18 = vsel %vm3702_vm9, %v1286_v10, 0.0  ;;  %vm1321_vm9 = vcmp.ge.s32.totalorder %v1311_v48, 0 }
 0x1c7   : > { %v1289_v22 = vadd.f32 %v2739_v17, %v3700_v40  ;;  %1527 = vrot.lane.b32.xlu0 %v1367_v18, %s3053_s12  ;;  %v1387_v30 = vrot.slane %v1367_v18, 7  ;;  %v1447_v8 = vrot.slane %v1367_v18, 1  ;;  %v1170_v47 = vpop.f32.mrb[3].mxu0  ;;  %vm3800_vm13 = vmand %vm1321_vm9, %vm1331_vm11 }
 0x1c8   : > { %v1288_v15 = vadd.f32 %v3700_v40, %v1170_v47  ;;  %vm3870_vm9 = vmand %vm1323_vm15, %vm1333_vm8 }
 0x1c9   : > { %v1370_v24 = vsel %vm3718_vm12, %v1289_v22, 0.0  ;;  %v3730_v25 = vsel %vm385_vm0, %v1457_v16, %v1447_v8  ;;  %v3734_v19 = vsel %vm385_vm0, %v1447_v8, %v1457_v16  ;;  %v3738_v26 = vsel %vm306_vm2, %v1387_v30, %v1397_v14 }
 0x1ca   : > { %1533 = vrot.lane.b32.xlu1 %v1370_v24, %s3053_s12  ;;  %v1398_v41 = vrot.slane %v1370_v24, 7  ;;  %v1458_v31 = vrot.slane %v1370_v24, 1  ;;  %v2742_v34 = vpop.f32.mrb[4].mxu0  ;;  %v1369_v35 = vsel %vm3718_vm12, %v1288_v15, 0.0  ;;  %v3752_v46 = vsel %vm306_vm2, %v1397_v14, %v1387_v30 }
 0x1cb   : > { %v1291_v58 = vadd.f32 %v2742_v34, %v3700_v40  ;;  %1531 = vrot.lane.b32.xlu0 %v1369_v35, %s3053_s12  ;;  %v1388_v59 = vrot.slane %v1369_v35, 7  ;;  %v1448_v44 = vrot.slane %v1369_v35, 1  ;;  %v1180_v45 = vpop.f32.mrb[5].mxu0  ;;  %vm1322_vm12 = vcmp.ge.s32.totalorder %v1312_v55, 0 }
 0x1cc   : > { %v1290_v49 = vadd.f32 %v3700_v40, %v1180_v45  ;;  %v1315_v55 = vadd.s32 8, %v3686_v61 }
 0x1cd   : > { %v1372_v28 = vsel %vm3744_vm7, %v1291_v58, 0.0  ;;  %v1468_v56 = vsel %vm385_vm0, %v1448_v44, %v1458_v31  ;;  %v1478_v20 = vsel %vm385_vm0, %v1458_v31, %v1448_v44  ;;  %v3764_v27 = vsel %vm306_vm2, %v1388_v59, %v1398_v41 }
 0x1ce   : > { %1537 = vrot.lane.b32.xlu1 %v1372_v28, %s3053_s12  ;;  %v1399_v50 = vrot.slane %v1372_v28, 7  ;;  %v1459_v51 = vrot.slane %v1372_v28, 1  ;;  %v2745_v42 = vpop.f32.mrb[6].mxu0  ;;  %v1371_v43 = vsel %vm3744_vm7, %v1290_v49, 0.0  ;;  %v3779_v38 = vsel %vm306_vm2, %v1398_v41, %v1388_v59  ;;  %vm3828_vm7 = vmand %vm1322_vm12, %vm1332_vm14 }
 0x1cf   : > { %v1293_v4 = vadd.f32 %v2745_v42, %v3700_v40  ;;  %1611 = vrot.lane.b32.xlu0 %v1468_v56, %s3054_s13  ;;  %v1190_v33 = vpop.f32.mrb[7].mxu0  ;;  %v1389_v23 = vrot.slane %v1371_v43, 7  ;;  %v1449_v37 = vrot.slane %v1371_v43, 1  ;;  %v1490_v0 = vsel %vm360_vm1, %v1478_v20, 0.0 }
 0x1d0   : > { %v1292_v63 = vadd.f32 %v3700_v40, %v1190_v33  ;;  %v1314_v49 = vadd.s32 7, %v3686_v61  ;;  %vm1325_vm12 = vcmp.ge.s32.totalorder %v1315_v55, 0  ;;  %vm1335_vm14 = vcmp.lt.s32.totalorder %v1315_v55, 16 }
 0x1d1   : > { %v1374_v39 = vsel %vm3771_vm10, %v1293_v4, 0.0  ;;  %v1469_v9 = vsel %vm385_vm0, %v1449_v37, %v1459_v51  ;;  %v1479_v32 = vsel %vm385_vm0, %v1459_v51, %v1449_v37  ;;  %v3793_v12 = vsel %vm306_vm2, %v1389_v23, %v1399_v50 }
 0x1d2   : > { %1613 = vrot.lane.b32.xlu1 %v1490_v0, %s3054_s13  ;;  %v2748_v13 = vpop.f32.mrb[8].mxu0  ;;  %v1400_v62 = vrot.slane %v1374_v39, 7  ;;  %v1460_v1 = vrot.slane %v1374_v39, 1  ;;  %v1373_v10 = vsel %vm3771_vm10, %v1292_v63, 0.0  ;;  %v3808_v18 = vsel %vm306_vm2, %v1399_v50, %v1389_v23 }
 0x1d3   : > { %v1295_v11 = vadd.f32 %v2748_v13, %v3700_v40  ;;  %1535 = vrot.lane.b32.xlu0 %v1371_v43, %s3053_s12  ;;  %v1200_v14 = vpop.f32.mrb[9].mxu0  ;;  %v1390_v16 = vrot.slane %v1373_v10, 7  ;;  %v1450_v17 = vrot.slane %v1373_v10, 1  ;;  %v1492_v45 = vsel %vm360_vm1, %v1479_v32, 0.0 }
 0x1d4   : > { %v1294_v21 = vadd.f32 %v3700_v40, %v1200_v14  ;;  %vm1324_vm10 = vcmp.ge.s32.totalorder %v1314_v49, 0  ;;  %vm1334_vm11 = vcmp.lt.s32.totalorder %v1314_v49, 16  ;;  %v1707_v14 = vld [vmem:[%s4358_s3] sm:$0xff] }
 0x1d5   : > { %v1376_v22 = vsel %vm3800_vm13, %v1295_v11, 0.0  ;;  %v1470_v30 = vsel %vm385_vm0, %v1450_v17, %v1460_v1  ;;  %v1480_v8 = vsel %vm385_vm0, %v1460_v1, %v1450_v17  ;;  %v3819_v47 = vsel %vm306_vm2, %v1390_v16, %v1400_v62 }
 0x1d6   : > { %1541 = vrot.lane.b32.xlu1 %v1374_v39, %s3053_s12  ;;  %v2751_v15 = vpop.f32.mrb[10].mxu0  ;;  %v1401_v48 = vrot.slane %v1376_v22, 7  ;;  %v1461_v24 = vrot.slane %v1376_v22, 1  ;;  %v3824_v41 = vsel %vm3800_vm13, %v1294_v21, 0.0  ;;  %v3838_v59 = vsel %vm306_vm2, %v1400_v62, %v1390_v16  ;;  %vm3926_vm13 = vmand %vm1324_vm10, %vm1334_vm11 }
 0x1d7   : > { %v1297_v34 = vadd.f32 %v2751_v15, %v3700_v40  ;;  %1615 = vrot.lane.b32.xlu0 %v1469_v9, %s3054_s13  ;;  %v1210_v35 = vpop.f32.mrb[11].mxu0  ;;  %v1391_v36 = vrot.slane %v3824_v41, 7  ;;  %v1451_v58 = vrot.slane %v3824_v41, 1  ;;  %v1316_v11 = vadd.s32 9, %v3686_v61  ;;  %v1708_v61 = vld [vmem:[%s4358_s3 + $0x8] sm:$0xff] }
 0x1d8   : > { %v1296_v44 = vadd.f32 %v3700_v40, %v1210_v35 }
 0x1d9   : > { %v3847_v28 = vsel %vm3828_vm7, %v1297_v34, 0.0  ;;  %v3851_v56 = vsel %vm385_vm0, %v1451_v58, %v1461_v24  ;;  %v3855_v20 = vsel %vm385_vm0, %v1461_v24, %v1451_v58  ;;  %v3859_v50 = vsel %vm306_vm2, %v1391_v36, %v1401_v48 }
 0x1da   : > { %1617 = vrot.lane.b32.xlu1 %v1492_v45, %s3054_s13  ;;  %v2754_v51 = vpop.f32.mrb[12].mxu0  ;;  %v1402_v42 = vrot.slane %v3847_v28, 7  ;;  %v1462_v43 = vrot.slane %v3847_v28, 1  ;;  %v3866_v3 = vsel %vm3828_vm7, %v1296_v44, 0.0  ;;  %v3880_v0 = vsel %vm306_vm2, %v1401_v48, %v1391_v36  ;;  %vm3962_vm7 = vmand %vm1325_vm12, %vm1335_vm14 }
 0x1db   : > { %v1299_v33 = vadd.f32 %v2754_v51, %v3700_v40  ;;  %1539 = vrot.lane.b32.xlu0 %v1373_v10, %s3053_s12  ;;  %v1220_v23 = vpop.f32.mrb[13].mxu0  ;;  %v1392_v37 = vrot.slane %v3866_v3, 7  ;;  %v1452_v63 = vrot.slane %v3866_v3, 1  ;;  %v3930_v24 = vpack.c.bf16 %v1708_v61, %v1707_v14 }
 0x1dc   : > { %v1298_v39 = vadd.f32 %v3700_v40, %v1220_v23  ;;  %vm1326_vm15 = vcmp.ge.s32.totalorder %v1316_v11, 0  ;;  %vm1336_vm8 = vcmp.lt.s32.totalorder %v1316_v11, 16 }
 0x1dd   : > { %v3885_v2 = vsel %vm3870_vm9, %v1299_v33, 0.0  ;;  %v3889_v9 = vsel %vm385_vm0, %v1452_v63, %v1462_v43  ;;  %v3893_v32 = vsel %vm385_vm0, %v1462_v43, %v1452_v63  ;;  %v3897_v13 = vsel %vm306_vm2, %v1392_v37, %v1402_v42  ;;  %2871 = vmatprep.subr.bf16.mxu1 %v3930_v24 }
 0x1de   : > { %1545 = vrot.lane.b32.xlu1 %v1376_v22, %s3053_s12  ;;  %v2757_v62 = vpop.f32.mrb[14].mxu0  ;;  %v1403_v1 = vrot.slane %v3885_v2, 7  ;;  %v1463_v10 = vrot.slane %v3885_v2, 1  ;;  %v3904_v7 = vsel %vm3870_vm9, %v1298_v39, 0.0  ;;  %v3916_v15 = vsel %vm306_vm2, %v1402_v42, %v1392_v37  ;;  %vm1346_vm9 = vmand %vm1326_vm15, %vm1336_vm8 }
 0x1df   : > { %v2882_v16 = vadd.f32 %v2757_v62, %v3670_v29  ;;  %1619 = vrot.lane.b32.xlu0 %v1470_v30, %s3054_s13  ;;  %v1230_v17 = vpop.f32.mrb[15].mxu0  ;;  %v1393_v21 = vrot.slane %v3904_v7, 7  ;;  %v1453_v22 = vrot.slane %v3904_v7, 1  ;;  %v1494_v29 = vsel %vm360_vm1, %v1480_v8, 0.0 }
 0x1e0   : > { %v2883_v48 = vadd.f32 %v1230_v17, %v3672_v52 }
 0x1e1   : > { %v1301_v31 = vadd.f32 %v2882_v16, %v3700_v40  ;;  %v3935_v34 = vsel %vm385_vm0, %v1463_v10, %v1453_v22  ;;  %v3939_v52 = vsel %vm385_vm0, %v1453_v22, %v1463_v10  ;;  %v3943_v8 = vsel %vm306_vm2, %v1393_v21, %v1403_v1 }
 0x1e2   : > { %v1300_v35 = vadd.f32 %v2883_v48, %v3700_v40  ;;  %1621 = vrot.lane.b32.xlu1 %v1494_v29, %s3054_s13  ;;  %v2760_v36 = vpop.f32.mrb[16].mxu0  ;;  %v3950_v58 = vsel %vm306_vm2, %v1403_v1, %v1393_v21 }
 0x1e3   : > { %v2884_v44 = vadd.f32 %v2760_v36, %v3674_v53  ;;  %1543 = vrot.lane.b32.xlu0 %v3824_v41, %s3053_s12  ;;  %v1240_v45 = vpop.f32.mrb[17].mxu0  ;;  %v1382_v49 = vsel %vm3926_vm13, %v1301_v31, 0.0 }
 0x1e4   : > { %v2885_v51 = vadd.f32 %v1240_v45, %v3676_v54  ;;  %v1464_v42 = vrot.slane %v1382_v49, 1  ;;  %v1381_v43 = vsel %vm3926_vm13, %v1300_v35, 0.0  ;;  %v1404_v41 = vrot.slane %v1382_v49, 7 }
 0x1e5   : > { %v1303_v53 = vadd.f32 %v2884_v44, %v3700_v40  ;;  %v1394_v33 = vrot.slane %v1381_v43, 7  ;;  %v1454_v23 = vrot.slane %v1381_v43, 1 }
 0x1e6   : > { %v1302_v37 = vadd.f32 %v2885_v51, %v3700_v40  ;;  %1549 = vrot.lane.b32.xlu1 %v3847_v28, %s3053_s12  ;;  %v2763_v54 = vpop.f32.mrb[18].mxu0  ;;  %v1496_v28 = vsel %vm360_vm1, %v3855_v20, 0.0 }
 0x1e7   : > { %v2886_v63 = vadd.f32 %v2763_v54, %v3678_v57  ;;  %1623 = vrot.lane.b32.xlu0 %v3851_v56, %s3054_s13  ;;  %v1250_v55 = vpop.f32.mrb[19].mxu0  ;;  %v1384_v39 = vsel %vm3962_vm7, %v1303_v53, 0.0  ;;  %v1474_v62 = vsel %vm385_vm0, %v1454_v23, %v1464_v42  ;;  %v1484_v1 = vsel %vm385_vm0, %v1464_v42, %v1454_v23 }
 0x1e8   : > { %v2887_v10 = vadd.f32 %v1250_v55, %v3680_v60  ;;  %v1405_v57 = vrot.slane %v1384_v39, 7  ;;  %v1465_v14 = vrot.slane %v1384_v39, 1  ;;  %v1383_v16 = vsel %vm3962_vm7, %v1302_v37, 0.0 }
 0x1e9   : > { %v1305_v56 = vadd.f32 %v2886_v63, %v3700_v40  ;;  %v3990_v17 = vsel %vm306_vm2, %v1394_v33, %v1404_v41  ;;  %v3994_v60 = vsel %vm306_vm2, %v1404_v41, %v1394_v33  ;;  %v1395_v21 = vrot.slane %v1383_v16, 7 }
 0x1ea   : > { %v1304_v20 = vadd.f32 %v2887_v10, %v3700_v40  ;;  %1625 = vrot.lane.b32.xlu1 %v1496_v28, %s3054_s13  ;;  %v1455_v11 = vrot.slane %v1383_v16, 1  ;;  %v1429_v41 = vsel %vm280_vm3, %v3779_v38, 0.0  ;;  %v1709_v38 = vld [vmem:[%s4358_s3 + $0x10] sm:$0xff] }
 0x1eb   : > { %1547 = vrot.lane.b32.xlu0 %v3866_v3, %s3053_s12  ;;  %v1386_v22 = vsel %vm1346_vm9, %v1305_v56, 0.0  ;;  %v4006_v40 = vsel %vm306_vm2, %v1395_v21, %v1405_v57  ;;  %v4010_v35 = vsel %vm306_vm2, %v1405_v57, %v1395_v21 }
 0x1ec   : > { %v1485_v61 = vsel %vm385_vm0, %v1465_v14, %v1455_v11  ;;  %v1475_v48 = vsel %vm385_vm0, %v1455_v11, %v1465_v14  ;;  %v1406_v29 = vrot.slane %v1386_v22, 7  ;;  %v1466_v30 = vrot.slane %v1386_v22, 1 }
 0x1ed   : > { %v1385_v31 = vsel %vm1346_vm9, %v1304_v20, 0.0  ;;  %v1433_v20 = vsel %vm280_vm3, %v3838_v59, 0.0  ;;  %v1435_v59 = vsel %vm280_vm3, %v3880_v0, 0.0  ;;  %v1437_v0 = vsel %vm280_vm3, %v3916_v15, 0.0 }
 0x1ee   : > { %1553 = vrot.lane.b32.xlu1 %v3885_v2, %s3053_s12  ;;  %v1396_v3 = vrot.slane %v1385_v31, 7  ;;  %v1456_v36 = vrot.slane %v1385_v31, 1  ;;  %v1498_v2 = vsel %vm360_vm1, %v3893_v32, 0.0  ;;  %v1502_v32 = vsel %vm360_vm1, %v1484_v1, 0.0 }
 0x1ef   : > { %1627 = vrot.lane.b32.xlu0 %v3889_v9, %s3054_s13  ;;  %v1500_v9 = vsel %vm360_vm1, %v3935_v34, 0.0  ;;  %v1488_v34 = vsel %vm360_vm1, %v3730_v25, 0.0  ;;  %v1439_v15 = vsel %vm280_vm3, %v3950_v58, 0.0  ;;  %v1441_v58 = vsel %vm280_vm3, %v3994_v60, 0.0 }
 0x1f0   : > { %v1486_v44 = vsel %vm385_vm0, %v1466_v30, %v1456_v36  ;;  %v1476_v45 = vsel %vm385_vm0, %v1456_v36, %v1466_v30  ;;  %v4022_v51 = vsel %vm306_vm2, %v1396_v3, %v1406_v29  ;;  %v4026_v42 = vsel %vm306_vm2, %v1406_v29, %v1396_v3 }
 0x1f1   : > { %v1443_v60 = vsel %vm280_vm3, %v4010_v35, 0.0 }
 0x1f2   : > { %1629 = vrot.lane.b32.xlu1 %v1498_v2, %s3054_s13 }
 0x1f3   : > { %1551 = vrot.lane.b32.xlu0 %v3904_v7, %s3053_s12  ;;  %v1504_v7 = vsel %vm360_vm1, %v1485_v61, 0.0 }
 0x1f6   : > { %1633 = vrot.lane.b32.xlu1 %v1500_v9, %s3054_s13 }
 0x1f7   : > { %1631 = vrot.lane.b32.xlu0 %v3939_v52, %s3054_s13  ;;  %v1506_v52 = vsel %vm360_vm1, %v1486_v44, 0.0 }
 0x1fa   : > { %1557 = vrot.lane.b32.xlu1 %v1382_v49, %s3053_s12 }
 0x1fb   : > { %1555 = vrot.lane.b32.xlu0 %v1381_v43, %s3053_s12 }
 0x1fe   : > { %1561 = vrot.lane.b32.xlu1 %v1384_v39, %s3053_s12  ;;  %v2507_v39 = vld [vmem:[%s4358_s3 + $0x30] sm:$0xff] }
 0x1ff   : > { %1635 = vrot.lane.b32.xlu0 %v1474_v62, %s3054_s13  ;;  %v2508_v62 = vld [vmem:[%s4358_s3 + $0x38] sm:$0xff] }
 0x200   : > { %v4103_v10 = vpack.c.bf16 %v2508_v62, %v2507_v39 }
 0x202   : > { %1637 = vrot.lane.b32.xlu1 %v1502_v32, %s3054_s13 }
 0x203   : > { %1559 = vrot.lane.b32.xlu0 %v1383_v16, %s3053_s12 }
 0x206   : > { %1641 = vrot.lane.b32.xlu1 %v1504_v7, %s3054_s13 }
 0x207   : > { %1639 = vrot.lane.b32.xlu0 %v1475_v48, %s3054_s13 }
 0x20a   : > { %1609 = vrot.lane.b32.xlu1 %v1488_v34, %s3054_s13 }
 0x20b   : > { %1607 = vrot.lane.b32.xlu0 %v3734_v19, %s3054_s13  ;;  %v1427_v19 = vsel %vm280_vm3, %v3752_v46, 0.0 }
 0x20e   : > { %1565 = vrot.lane.b32.xlu1 %v1386_v22, %s3053_s12 }
 0x20f   : > { %1563 = vrot.lane.b32.xlu0 %v1385_v31, %s3053_s12 }
 0x212   : > { %1645 = vrot.lane.b32.xlu1 %v1506_v52, %s3054_s13 }
 0x213   : > { %1643 = vrot.lane.b32.xlu0 %v1476_v45, %s3054_s13 }
 0x238   : > { %v1530_v49 = vpop.permute.xlu1 %1529 }
 0x239   : > { %v4066_v25 = vsel %vm630_vm4, %v3738_v26, %v1530_v49  ;;  %v1528_v43 = vpop.permute.xlu0 %1527 }
 0x23a   : > { %v4072_v4 = vsel %vm630_vm4, %v1427_v19, %v1528_v43 }
 0x23c   : > { %v1534_v53 = vpop.permute.xlu1 %1533 }
 0x23d   : > { %v1532_v6 = vpop.permute.xlu0 %1531  ;;  %v1670_v46 = vsel %vm630_vm4, %v3764_v27, %v1534_v53  ;;  %v1431_v27 = vsel %vm280_vm3, %v3808_v18, 0.0 }
 0x23e   : > { %v1669_v23 = vsel %vm630_vm4, %v1429_v41, %v1532_v6 }
 0x240   : > { %v1538_v33 = vpop.permute.xlu1 %1537 }
 0x241   : > { %v1612_v37 = vpop.permute.xlu0 %1611 }
 0x242   : > { %v4079_v26 = vsel %vm655_vm5, %v1669_v23, %v1612_v37 }
 0x243   : > { %2770 = vmatprep.mubr.msk.f32.mxu1 %vm687_vm6, %v4079_v26 }
 0x244   : > { %v1614_v54 = vpop.permute.xlu1 %1613 }
 0x245   : > { %v4086_v63 = vsel %vm655_vm5, %v1670_v46, %v1614_v54  ;;  %v1536_v55 = vpop.permute.xlu0 %1535 }
 0x246   : > { %2771 = vmatmul.mubr.msk.f32.vlgmr.msra.gmra.mrb[6].mxu1 %vm687_vm6, %v4086_v63  ;;  %v1671_v28 = vsel %vm630_vm4, %v1431_v27, %v1536_v55 }
 0x247   : > { %2873 = vmatpush3.bf16.msra.mxu1 %v3930_v24  ;;  %v1672_v24 = vsel %vm630_vm4, %v3793_v12, %v1538_v33 }
 0x248   : > { %v1542_v1 = vpop.permute.xlu1 %1541  ;;  %2798 = vmatprep.subr.mxu1 %v1709_v38 }
 0x249   : > { %v1616_v57 = vpop.permute.xlu0 %1615  ;;  %v1674_v61 = vsel %vm630_vm4, %v3819_v47, %v1542_v1 }
 0x24a   : > { %v4107_v14 = vsel %vm655_vm5, %v1671_v28, %v1616_v57 }
 0x24b   : > { %2773 = vmatprep.mubr.msk.f32.mxu1 %vm687_vm6, %v4107_v14  ;;  %2799 = vmatpush3.msra.mxu1 %v1709_v38 }
 0x24c   : > { %v1618_v56 = vpop.permute.xlu1 %1617  ;;  %2875 = vmatprep.subr.bf16.mxu1 %v4103_v10 }
 0x24d   : > { %v4115_v18 = vsel %vm655_vm5, %v1672_v24, %v1618_v56  ;;  %v1540_v16 = vpop.permute.xlu0 %1539 }
 0x24e   : > { %2774 = vmatmul.mubr.msk.f32.gmra.mrb[8].mxu1 %vm687_vm6, %v4115_v18  ;;  %v1673_v11 = vsel %vm630_vm4, %v1433_v20, %v1540_v16 }
 0x250   : > { %v1546_v21 = vpop.permute.xlu1 %1545 }
 0x251   : > { %v1620_v22 = vpop.permute.xlu0 %1619  ;;  %v1676_v47 = vsel %vm630_vm4, %v3859_v50, %v1546_v21 }
 0x252   : > { %v4124_v12 = vsel %vm655_vm5, %v1673_v11, %v1620_v22 }
 0x253   : > { %2776 = vmatprep.mubr.msk.f32.mxu1 %vm687_vm6, %v4124_v12 }
 0x254   : > { %v1622_v48 = vpop.permute.xlu1 %1621 }
 0x255   : > { %v4131_v29 = vsel %vm655_vm5, %v1674_v61, %v1622_v48  ;;  %v1544_v30 = vpop.permute.xlu0 %1543 }
 0x256   : > { %2777 = vmatmul.mubr.msk.f32.gmra.mrb[10].mxu1 %vm687_vm6, %v4131_v29  ;;  %v1675_v3 = vsel %vm630_vm4, %v1435_v59, %v1544_v30 }
 0x258   : > { %v1550_v31 = vpop.permute.xlu1 %1549 }
 0x259   : > { %v1624_v36 = vpop.permute.xlu0 %1623  ;;  %v1678_v50 = vsel %vm630_vm4, %v3897_v13, %v1550_v31  ;;  %v2997_v31 = vld [vmem:[%s3135_s11 + $0x28] sm:$0xff] }
 0x25a   : > { %v4140_v44 = vsel %vm655_vm5, %v1675_v3, %v1624_v36 }
 0x25b   : > { %2779 = vmatprep.mubr.msk.f32.mxu1 %vm687_vm6, %v4140_v44 }
 0x25c   : > { %v1626_v45 = vpop.permute.xlu1 %1625 }
 0x25d   : > { %v4147_v2 = vsel %vm655_vm5, %v1676_v47, %v1626_v45  ;;  %v1548_v9 = vpop.permute.xlu0 %1547  ;;  %v2998_v47 = vld [vmem:[%s3135_s11 + $0x20] sm:$0xff] }
 0x25e   : > { %2780 = vmatmul.mubr.msk.f32.gmra.mrb[12].mxu1 %vm687_vm6, %v4147_v2  ;;  %v1677_v7 = vsel %vm630_vm4, %v1437_v0, %v1548_v9 }
 0x260   : > { %v1554_v32 = vpop.permute.xlu1 %1553 }
 0x261   : > { %v1628_v34 = vpop.permute.xlu0 %1627  ;;  %v1680_v33 = vsel %vm630_vm4, %v3943_v8, %v1554_v32 }
 0x262   : > { %v4156_v52 = vsel %vm655_vm5, %v1677_v7, %v1628_v34  ;;  %v2999_v7 = vld [vmem:[%s3135_s11 + $0x38] sm:$0xff] }
 0x263   : > { %2782 = vmatprep.mubr.msk.f32.mxu1 %vm687_vm6, %v4156_v52 }
 0x264   : > { %v1630_v49 = vpop.permute.xlu1 %1629 }
 0x265   : > { %v4163_v43 = vsel %vm655_vm5, %v1678_v50, %v1630_v49  ;;  %v1552_v19 = vpop.permute.xlu0 %1551  ;;  %v3000_v49 = vld [vmem:[%s3135_s11 + $0x30] sm:$0xff] }
 0x266   : > { %2783 = vmatmul.mubr.msk.f32.gmra.mrb[14].mxu1 %vm687_vm6, %v4163_v43  ;;  %v1679_v6 = vsel %vm630_vm4, %v1439_v15, %v1552_v19 }
 0x268   : > { %v1634_v53 = vpop.permute.xlu1 %1633 }
 0x269   : > { %v1632_v41 = vpop.permute.xlu0 %1631  ;;  %v1700_v23 = vsel %vm655_vm5, %v1680_v33, %v1634_v53 }
 0x26a   : > { %v1699_v13 = vsel %vm655_vm5, %v1679_v6, %v1632_v41  ;;  %v3001_v41 = vld [vmem:[%s3135_s11 + $0x48] sm:$0xff] }
 0x26b   : > { %2785 = vmatprep.mubr.msk.f32.mxu1 %vm687_vm6, %v1699_v13 }
 0x26c   : > { %2786 = vmatmul.mubr.msk.f32.gmra.mrb[16].mxu1 %vm687_vm6, %v1700_v23  ;;  %v1558_v37 = vpop.permute.xlu1 %1557 }
 0x26d   : > { %v1556_v46 = vpop.permute.xlu0 %1555  ;;  %v1682_v39 = vsel %vm630_vm4, %v3990_v17, %v1558_v37  ;;  %v3002_v37 = vld [vmem:[%s3135_s11 + $0x40] sm:$0xff] }
 0x26e   : > { %v1681_v55 = vsel %vm630_vm4, %v1441_v58, %v1556_v46 }
 0x270   : > { %v1562_v54 = vpop.permute.xlu1 %1561 }
 0x271   : > { %v1636_v38 = vpop.permute.xlu0 %1635  ;;  %v1684_v56 = vsel %vm630_vm4, %v4006_v40, %v1562_v54  ;;  %v2509_v40 = vld [vmem:[%s4358_s3 + $0x40] sm:$0xff] }
 0x272   : > { %v1701_v8 = vsel %vm655_vm5, %v1681_v55, %v1636_v38 }
 0x273   : > { %2788 = vmatprep.mubr.msk.f32.mxu1 %vm687_vm6, %v1701_v8 }
 0x274   : > { %v1638_v62 = vpop.permute.xlu1 %1637 }
 0x275   : > { %v1702_v27 = vsel %vm655_vm5, %v1682_v39, %v1638_v62  ;;  %v1560_v1 = vpop.permute.xlu0 %1559 }
 0x276   : > { %2789 = vmatmul.mubr.msk.f32.gmra.mrb[18].mxu1 %vm687_vm6, %v1702_v27  ;;  %v1683_v57 = vsel %vm630_vm4, %v1443_v60, %v1560_v1  ;;  %v3004_v1 = vld [vmem:[%s3135_s11 + $0x50] sm:$0xff] }
 0x278   : > { %v1642_v28 = vpop.permute.xlu1 %1641 }
 0x279   : > { %v1640_v24 = vpop.permute.xlu0 %1639  ;;  %v1704_v17 = vsel %vm655_vm5, %v1684_v56, %v1642_v28 }
 0x27a   : > { %v1703_v16 = vsel %vm655_vm5, %v1683_v57, %v1640_v24 }
 0x27b   : > { %2791 = vmatprep.mubr.msk.f32.mxu1 %vm687_vm6, %v1703_v16 }
 0x27c   : > { %v1610_v20 = vpop.permute.xlu1 %1609  ;;  %2792 = vmatmul.mubr.msk.f32.gmra.mrb[20].mxu1 %vm687_vm6, %v1704_v17 }
 0x27d   : > { %v1608_v21 = vpop.permute.xlu0 %1607  ;;  %v1688_v11 = vsel %vm655_vm5, %v4066_v25, %v1610_v20 }
 0x27e   : > { %v1687_v35 = vsel %vm655_vm5, %v4072_v4, %v1608_v21 }
 0x27f   : > { %2800 = vmatprep.mubr.msk.f32.mxu1 %vm687_vm6, %v1687_v35  ;;  %v3006_v35 = vld [vmem:[%s3135_s11 + $0x60] sm:$0xff] }
 0x280   : > { %2801 = vmatmul.mubr.msk.f32.vlgmr.msra.gmra.mrb[6].mxu1 %vm687_vm6, %v1688_v11  ;;  %v1566_v4 = vpop.permute.xlu1 %1565 }
 0x281   : > { %2877 = vmatpush3.bf16.msra.mxu1 %v4103_v10  ;;  %2803 = vmatprep.mubr.msk.f32.mxu1 %vm687_vm6, %v4079_v26  ;;  %v1564_v25 = vpop.permute.xlu0 %1563  ;;  %v1686_v22 = vsel %vm630_vm4, %v4022_v51, %v1566_v4 }
 0x282   : > { %2828 = vmatprep.subr.mxu1 %v2509_v40 }
 0x284   : > { %2804 = vmatmul.mubr.msk.f32.gmra.mrb[8].mxu1 %vm687_vm6, %v4086_v63  ;;  %v1445_v63 = vsel %vm280_vm3, %v4026_v42, 0.0 }
 0x285   : > { %2806 = vmatprep.mubr.msk.f32.mxu1 %vm687_vm6, %v4107_v14  ;;  %2829 = vmatpush3.msra.mxu1 %v2509_v40  ;;  %v1644_v26 = vpop.permute.xlu0 %1643  ;;  %v1685_v10 = vsel %vm630_vm4, %v1445_v63, %v1564_v25  ;;  %v3007_v63 = vld [vmem:[%s3135_s11 + $0x78] sm:$0xff] }
 0x288   : > { %2807 = vmatmul.mubr.msk.f32.gmra.mrb[10].mxu1 %vm687_vm6, %v4115_v18 }
 0x289   : > { %2809 = vmatprep.mubr.msk.f32.mxu1 %vm687_vm6, %v4124_v12 }
 0x28c   : > { %2810 = vmatmul.mubr.msk.f32.gmra.mrb[12].mxu1 %vm687_vm6, %v4131_v29 }
 0x28d   : > { %2812 = vmatprep.mubr.msk.f32.mxu1 %vm687_vm6, %v4140_v44 }
 0x290   : > { %2813 = vmatmul.mubr.msk.f32.gmra.mrb[14].mxu1 %vm687_vm6, %v4147_v2 }
 0x291   : > { %2815 = vmatprep.mubr.msk.f32.mxu1 %vm687_vm6, %v4156_v52 }
 0x294   : > { %2816 = vmatmul.mubr.msk.f32.gmra.mrb[16].mxu1 %vm687_vm6, %v4163_v43 }
 0x295   : > { %2818 = vmatprep.mubr.msk.f32.mxu1 %vm687_vm6, %v1699_v13 }
 0x298   : > { %2819 = vmatmul.mubr.msk.f32.gmra.mrb[18].mxu1 %vm687_vm6, %v1700_v23 }
 0x299   : > { %2821 = vmatprep.mubr.msk.f32.mxu1 %vm687_vm6, %v1701_v8 }
 0x29c   : > { %2822 = vmatmul.mubr.msk.f32.gmra.mrb[20].mxu1 %vm687_vm6, %v1702_v27 }
 0x29d   : > { %2830 = vmatprep.mubr.msk.f32.mxu1 %vm687_vm6, %v4107_v14  ;;  %v1646_v14 = vpop.permute.xlu1 %1645 }
 0x2a0   : > { %2831 = vmatmul.mubr.msk.f32.vlgmr.msra.gmra.mrb[6].mxu1 %vm687_vm6, %v4115_v18  ;;  %v1705_v18 = vsel %vm655_vm5, %v1685_v10, %v1644_v26 }
 0x2a1   : > { %2833 = vmatprep.mubr.msk.f32.mxu1 %vm687_vm6, %v4124_v12  ;;  %v1706_v12 = vsel %vm655_vm5, %v1686_v22, %v1646_v14  ;;  %v3008_v22 = vld [vmem:[%s3135_s11 + $0x70] sm:$0xff] }
 0x2a4   : > { %2834 = vmatmul.mubr.msk.f32.gmra.mrb[8].mxu1 %vm687_vm6, %v4131_v29 }
 0x2a5   : > { %2836 = vmatprep.mubr.msk.f32.mxu1 %vm687_vm6, %v4140_v44 }
 0x2a8   : > { %2837 = vmatmul.mubr.msk.f32.gmra.mrb[10].mxu1 %vm687_vm6, %v4147_v2 }
 0x2a9   : > { %2839 = vmatprep.mubr.msk.f32.mxu1 %vm687_vm6, %v4156_v52 }
 0x2ac   : > { %2840 = vmatmul.mubr.msk.f32.gmra.mrb[12].mxu1 %vm687_vm6, %v4163_v43 }
 0x2ad   : > { %2842 = vmatprep.mubr.msk.f32.mxu1 %vm687_vm6, %v1699_v13 }
 0x2b0   : > { %2843 = vmatmul.mubr.msk.f32.gmra.mrb[14].mxu1 %vm687_vm6, %v1700_v23 }
 0x2b1   : > { %2845 = vmatprep.mubr.msk.f32.mxu1 %vm687_vm6, %v1701_v8  ;;  %v3003_v8 = vld [vmem:[%s3135_s11 + $0x58] sm:$0xff] }
 0x2b4   : > { %2846 = vmatmul.mubr.msk.f32.gmra.mrb[16].mxu1 %vm687_vm6, %v1702_v27 }
 0x2b5   : > { %2848 = vmatprep.mubr.msk.f32.mxu1 %vm687_vm6, %v1703_v16  ;;  %v3005_v16 = vld [vmem:[%s3135_s11 + $0x68] sm:$0xff] }
 0x2b8   : > { %2849 = vmatmul.mubr.msk.f32.gmra.mrb[18].mxu1 %vm687_vm6, %v1704_v17 }
 0x2b9   : > { %2851 = vmatprep.mubr.msk.f32.mxu1 %vm687_vm6, %v1705_v18 }
 0x2bc   : > { %2852 = vmatmul.mubr.msk.f32.gmra.mrb[20].mxu1 %vm687_vm6, %v1706_v12 }
 0x373   : > { %v2832_v42 = vpop.f32.mrb[6].mxu1 }
 0x374   : > { %v2237_v51 = vadd.f32 %v2832_v42, %v4269_v5  ;;  %v2134_v61 = vpop.f32.mrb[7].mxu1 }
 0x375   : > { %v2236_v48 = vadd.f32 %v4269_v5, %v2134_v61 }
 0x376   : > { %v2253_v29 = vmax.f32 %v2237_v51, 0.0 }
 0x377   : > { %v2252_v30 = vmax.f32 %v2236_v48, 0.0  ;;  %v2835_v59 = vpop.f32.mrb[8].mxu1 }
 0x378   : > { %v2269_v3 = vadd.f32 %v2997_v31, %v2253_v29  ;;  %v2239_v36 = vadd.f32 %v2835_v59, %v4269_v5  ;;  %v2144_v44 = vpop.f32.mrb[9].mxu1  ;;  %v3009_v29 = vld [vmem:[%s3135_s11 + $0x88] sm:$0xff] }
 0x379   : > { %v2268_v45 = vadd.f32 %v2998_v47, %v2252_v30  ;;  %v2238_v2 = vadd.f32 %v4269_v5, %v2144_v44 }
 0x37a   : > { %2285 = vst.msk [vmem:[%s4276_s19 + $0x8] sm:$0xff] %vm630_vm4, %v2269_v3  ;;  %v2255_v9 = vmax.f32 %v2239_v36, 0.0  ;;  %v3010_v3 = vld [vmem:[%s3135_s11 + $0x80] sm:$0xff] }
 0x37b   : > { %2284 = vst.msk [vmem:[%s4276_s19] sm:$0xff] %vm630_vm4, %v2268_v45  ;;  %v2254_v0 = vmax.f32 %v2238_v2, 0.0  ;;  %v2838_v32 = vpop.f32.mrb[10].mxu1  ;;  %v3011_v2 = vld [vmem:[%s3135_s11 + $0x98] sm:$0xff] }
 0x37c   : > { %v2271_v34 = vadd.f32 %v2999_v7, %v2255_v9  ;;  %v2241_v52 = vadd.f32 %v2838_v32, %v4269_v5  ;;  %v2154_v50 = vpop.f32.mrb[11].mxu1 }
 0x37d   : > { %v2270_v43 = vadd.f32 %v3000_v49, %v2254_v0  ;;  %v2240_v19 = vadd.f32 %v4269_v5, %v2154_v50  ;;  %v3012_v0 = vld [vmem:[%s3135_s11 + $0x90] sm:$0xff] }
 0x37e   : > { %2287 = vst.msk [vmem:[%s4276_s19 + $0x18] sm:$0xff] %vm630_vm4, %v2271_v34  ;;  %v2257_v15 = vmax.f32 %v2241_v52, 0.0 }
 0x37f   : > { %2286 = vst.msk [vmem:[%s4276_s19 + $0x10] sm:$0xff] %vm630_vm4, %v2270_v43  ;;  %v2256_v53 = vmax.f32 %v2240_v19, 0.0  ;;  %v2841_v6 = vpop.f32.mrb[12].mxu1 }
 0x380   : > { %v2273_v33 = vadd.f32 %v3001_v41, %v2257_v15  ;;  %v2243_v13 = vadd.f32 %v2841_v6, %v4269_v5  ;;  %v2164_v23 = vpop.f32.mrb[13].mxu1 }
 0x381   : > { %v2272_v46 = vadd.f32 %v3002_v37, %v2256_v53  ;;  %v2242_v58 = vadd.f32 %v4269_v5, %v2164_v23 }
 0x382   : > { %2289 = vst.msk [vmem:[%s4276_s19 + $0x28] sm:$0xff] %vm630_vm4, %v2273_v33  ;;  %v2259_v54 = vmax.f32 %v2243_v13, 0.0 }
 0x383   : > { %2288 = vst.msk [vmem:[%s4276_s19 + $0x20] sm:$0xff] %vm630_vm4, %v2272_v46  ;;  %v2258_v55 = vmax.f32 %v2242_v58, 0.0  ;;  %v2844_v38 = vpop.f32.mrb[14].mxu1 }
 0x384   : > { %v2275_v39 = vadd.f32 %v3003_v8, %v2259_v54  ;;  %v2245_v62 = vadd.f32 %v2844_v38, %v4269_v5  ;;  %v2174_v27 = vpop.f32.mrb[15].mxu1 }
 0x385   : > { %v2274_v60 = vadd.f32 %v3004_v1, %v2258_v55  ;;  %v2244_v28 = vadd.f32 %v4269_v5, %v2174_v27 }
 0x386   : > { %2291 = vst.msk [vmem:[%s4276_s19 + $0x38] sm:$0xff] %vm630_vm4, %v2275_v39  ;;  %v2261_v57 = vmax.f32 %v2245_v62, 0.0 }
 0x387   : > { %2290 = vst.msk [vmem:[%s4276_s19 + $0x30] sm:$0xff] %vm630_vm4, %v2274_v60  ;;  %v2260_v24 = vmax.f32 %v2244_v28, 0.0  ;;  %v2847_v56 = vpop.f32.mrb[16].mxu1 }
 0x388   : > { %v2277_v17 = vadd.f32 %v3005_v16, %v2261_v57  ;;  %v2247_v20 = vadd.f32 %v2847_v56, %v4269_v5  ;;  %v2184_v21 = vpop.f32.mrb[17].mxu1 }
 0x389   : > { %v2276_v11 = vadd.f32 %v3006_v35, %v2260_v24  ;;  %v2246_v40 = vadd.f32 %v4269_v5, %v2184_v21 }
 0x38a   : > { %2293 = vst.msk [vmem:[%s4276_s19 + $0x48] sm:$0xff] %vm630_vm4, %v2277_v17  ;;  %v2263_v25 = vmax.f32 %v2247_v20, 0.0 }
 0x38b   : > { %2292 = vst.msk [vmem:[%s4276_s19 + $0x40] sm:$0xff] %vm630_vm4, %v2276_v11  ;;  %v2262_v4 = vmax.f32 %v2246_v40, 0.0  ;;  %v2850_v26 = vpop.f32.mrb[18].mxu1 }
 0x38c   : > { %v2279_v10 = vadd.f32 %v3007_v63, %v2263_v25  ;;  %v2249_v14 = vadd.f32 %v2850_v26, %v4269_v5  ;;  %v2194_v18 = vpop.f32.mrb[19].mxu1 }
 0x38d   : > { %v2278_v12 = vadd.f32 %v3008_v22, %v2262_v4  ;;  %v2248_v42 = vadd.f32 %v4269_v5, %v2194_v18 }
 0x38e   : > { %2295 = vst.msk [vmem:[%s4276_s19 + $0x58] sm:$0xff] %vm630_vm4, %v2279_v10  ;;  %v2265_v51 = vmax.f32 %v2249_v14, 0.0 }
 0x38f   : > { %2294 = vst.msk [vmem:[%s4276_s19 + $0x50] sm:$0xff] %vm630_vm4, %v2278_v12  ;;  %v2264_v61 = vmax.f32 %v2248_v42, 0.0  ;;  %v2853_v48 = vpop.f32.mrb[20].mxu1 }
 0x390   : > { %v2281_v30 = vadd.f32 %v3009_v29, %v2265_v51  ;;  %v2251_v59 = vadd.f32 %v2853_v48, %v4269_v5  ;;  %v2204_v31 = vpop.f32.mrb[21].mxu1 }
 0x391   : > { %v2280_v36 = vadd.f32 %v3010_v3, %v2264_v61  ;;  %v2250_v44 = vadd.f32 %v4269_v5, %v2204_v31 }
 0x392   : > { %2297 = vst.msk [vmem:[%s4276_s19 + $0x68] sm:$0xff] %vm630_vm4, %v2281_v30  ;;  %v2267_v47 = vmax.f32 %v2251_v59, 0.0 }
 0x393   : > { %2296 = vst.msk [vmem:[%s4276_s19 + $0x60] sm:$0xff] %vm630_vm4, %v2280_v36  ;;  %v2266_v45 = vmax.f32 %v2250_v44, 0.0 }
 0x394   : > { %v2283_v9 = vadd.f32 %v3011_v2, %v2267_v47 }
 0x395   : > { %v2282_v32 = vadd.f32 %v3012_v0, %v2266_v45 }
 0x396   : > { %2299 = vst.msk [vmem:[%s4276_s19 + $0x78] sm:$0xff] %vm630_vm4, %v2283_v9 }
 0x397   : > { %2298 = vst.msk [vmem:[%s4276_s19 + $0x70] sm:$0xff] %vm630_vm4, %v2282_v32 }
 0x398 PF: > { %s15_s22 = sadd.s32 1, %s3051_s22   ;;  %s4379_s18 = smov %s3043_s20 }
 0x399   : > { %p12_p7 = scmp.ge.s32.totalorder %s15_s22, 6   ;;  %s4380_s19 = smov %s3047_s21 }
 0x39a   : > { %s4381_s20 = smov %s4384_s23  ;;  %s4382_s21 = smov %s4388_s24 }
 0x39b   :  { %14 = sbr.rel (!%p12_p7) target bundleno = 3 (0x3), region = 75 }

</bundles_post_ra>
